<compile_context>
chip_gen: v7x
topology: tpu7x:2x2x1
jax: 0.10.0
libtpu: 0.0.40
codegen_flags: <defaults>
</compile_context>

<pallas_src>
import math
import functools

import jax
import jax.numpy as jnp
from jax.experimental import pallas as pl
from jax.experimental.pallas import tpu as pltpu


# -----------------------------------------------------------------------------
# Pallas kernel
# -----------------------------------------------------------------------------
def _layer_norm(x, gamma, beta, eps=1e-5):
    # PyTorch LayerNorm: biased variance over the last dim.
    # E[x^2] - mean^2 so the two cross-lane reductions are independent.
    mu = jnp.mean(x, axis=-1, keepdims=True)
    ms = jnp.mean(x * x, axis=-1, keepdims=True)
    var = ms - mu * mu
    return (x - mu) * jax.lax.rsqrt(var + eps) * gamma + beta


def cross_transformer_kernel(
    src1_ref, src2_ref,                 # (bt*N1, Cin) bf16, (bt*N2, Cin) bf16
    wp_ref, bp_ref,                     # Conv1d k=1 proj: (Cin, C) bf16, (1, C) f32
    g13_ref, b13_ref,                   # norm13: (1, C) f32
    wq_ref, bq_ref, wk_ref, bk_ref, wv_ref, bv_ref,   # MHA in-proj (C, C) bf16 / (1, C) f32
    wo_ref, bo_ref,                     # MHA out-proj: (C, C) bf16, (1, C) f32
    g12_ref, b12_ref,                   # norm12: (1, C) f32
    w11_ref, b11_ref,                   # linear11: (C, F) bf16, (1, F) f32
    w12_ref, b12f_ref,                  # linear12: (F, C) bf16, (1, C) f32
    out_ref,                            # (bt*N1, C) f32
    *, nhead, batch_tile, n1, n2,
):
    f32 = jnp.float32
    bf16 = jnp.bfloat16

    x1 = src1_ref[...]                  # bf16
    x2 = src2_ref[...]                  # bf16

    # ---- input_proj: Conv1d(kernel_size=1)  ==  x @ Wp^T + b  (Wp pre-transposed)
    wp = wp_ref[...]
    bp = bp_ref[...]
    h1 = jnp.dot(x1, wp, preferred_element_type=f32) + bp       # (bt*n1, C) f32
    h2 = jnp.dot(x2, wp, preferred_element_type=f32) + bp       # (bt*n2, C) f32

    # ---- norm13 on both streams (f32 statistics) ----------------------------
    g13, b13 = g13_ref[...], b13_ref[...]
    h1 = _layer_norm(h1, g13, b13)      # kept in f32 for the residual
    h2 = _layer_norm(h2, g13, b13)

    h1b = h1.astype(bf16)
    h2b = h2.astype(bf16)

    # ---- MHA in-projections (weights pre-transposed, bf16 MXU, f32 accum) ---
    q = jnp.dot(h1b, wq_ref[...], preferred_element_type=f32) + bq_ref[...]   # (bt*n1, C)
    k = jnp.dot(h2b, wk_ref[...], preferred_element_type=f32) + bk_ref[...]   # (bt*n2, C)
    v = jnp.dot(h2b, wv_ref[...], preferred_element_type=f32) + bv_ref[...]   # (bt*n2, C)

    c = q.shape[-1]
    dh = c // nhead
    scale = 1.0 / math.sqrt(dh)

    # ---- head-batched cross attention; per-batch-element (no cross-batch mix)
    # TODO(synk): for large N1/N2, flash-tile the (N1, N2) score matrix over N2
    # (online softmax) and set vmem_limit_bytes for v7x's 64 MiB VMEM.
    attn_rows = []
    for b in range(batch_tile):         # small static unrolled loop over batch tile
        q_b = q[b * n1:(b + 1) * n1, :] * scale                  # (n1, C) f32
        k_b = k[b * n2:(b + 1) * n2, :]                          # (n2, C) f32
        v_b = v[b * n2:(b + 1) * n2, :]                          # (n2, C) f32

        # (N, C) -> (N, H, dh) -> head-major (H, N, dh)
        qh = pltpu.einshape("nhd->hnd", q_b.reshape(n1, nhead, dh)).astype(bf16)
        kh = pltpu.einshape("nhd->hnd", k_b.reshape(n2, nhead, dh)).astype(bf16)
        vh = pltpu.einshape("nhd->hnd", v_b.reshape(n2, nhead, dh)).astype(bf16)

        s = jnp.einsum("hqd,hkd->hqk", qh, kh,
                       preferred_element_type=f32)               # (H, n1, n2) f32
        s = s - jnp.max(s, axis=-1, keepdims=True)
        p = jnp.exp(s)
        p = p * pl.reciprocal(jnp.sum(p, axis=-1, keepdims=True), approx=True)
        o = jnp.einsum("hqk,hkd->hqd", p.astype(bf16), vh,
                       preferred_element_type=f32)               # (H, n1, dh) f32
        attn_rows.append(pltpu.einshape("hnd->nhd", o).reshape(n1, c))

    attn = jnp.concatenate(attn_rows, axis=0) if batch_tile > 1 else attn_rows[0]

    # ---- MHA out-projection --------------------------------------------------
    attn = jnp.dot(attn.astype(bf16), wo_ref[...],
                   preferred_element_type=f32) + bo_ref[...]      # (bt*n1, C)

    # ---- residual + norm12 ---------------------------------------------------
    y = _layer_norm(h1 + attn, g12_ref[...], b12_ref[...])        # f32

    # ---- feed-forward: linear12(GELU(linear11(y))) ---------------------------
    ff = jnp.dot(y.astype(bf16), w11_ref[...],
                 preferred_element_type=f32) + b11_ref[...]       # (bt*n1, F)
    # exact-erf GELU (matches torch.nn.GELU()).
    # TODO(synk): on v5e consider the tanh approximation (EUP) if numerics allow.
    ff = 0.5 * ff * (1.0 + jax.lax.erf(ff * (1.0 / math.sqrt(2.0))))
    ff = jnp.dot(ff.astype(bf16), w12_ref[...],
                 preferred_element_type=f32) + b12f_ref[...]      # (bt*n1, C)

    out_ref[...] = (y + ff).astype(out_ref.dtype)


# -----------------------------------------------------------------------------
# Wrapper
# -----------------------------------------------------------------------------
def cross_transformer_forward(src1, src2, params, nhead=4, batch_tile=None):
    """src1: (B, Cin, N1), src2: (B, Cin, N2)  ->  (B, Cout, N1)."""
    B, Cin, N1 = src1.shape
    _, _, N2 = src2.shape
    C = params["wp"].shape[0]

    # Fuse batch elements into the row axis so each grid step feeds the MXU
    # with more rows (amortizes per-step pipeline overhead).  Keep the tile
    # bounded so VMEM stays small and the in-kernel attention unroll is short.
    if batch_tile is None:
        batch_tile = 1
        for bt in range(1, B + 1):
            if B % bt == 0 and bt <= 8 and bt * max(N1, N2) <= 512:
                batch_tile = bt
    assert B % batch_tile == 0
    num_tiles = B // batch_tile
    rows1 = batch_tile * N1
    rows2 = batch_tile * N2

    f32, bf16 = jnp.float32, jnp.bfloat16

    # NCL -> (B*N, C): channels on the 128-lane axis, batch fused into rows.
    x1 = jnp.transpose(src1, (0, 2, 1)).reshape(B * N1, Cin).astype(bf16)
    x2 = jnp.transpose(src2, (0, 2, 1)).reshape(B * N2, Cin).astype(bf16)

    # Pre-transpose every weight once (no in-kernel .T); bf16 for the MXU.
    prepped = {
        "wp": params["wp"].T.astype(bf16),      # (Cin, C)
        "bp": params["bp"].astype(f32),
        "g13": params["g13"].astype(f32),
        "b13": params["b13"].astype(f32),
        "wq": params["wq"].T.astype(bf16),      # (C, C)
        "bq": params["bq"].astype(f32),
        "wk": params["wk"].T.astype(bf16),
        "bk": params["bk"].astype(f32),
        "wv": params["wv"].T.astype(bf16),
        "bv": params["bv"].astype(f32),
        "wo": params["wo"].T.astype(bf16),
        "bo": params["bo"].astype(f32),
        "g12": params["g12"].astype(f32),
        "b12": params["b12"].astype(f32),
        "w11": params["w11"].T.astype(bf16),    # (C, F)
        "b11": params["b11"].astype(f32),
        "w12": params["w12"].T.astype(bf16),    # (F, C)
        "b12f": params["b12f"].astype(f32),
    }
    param_order = [
        "wp", "bp", "g13", "b13",
        "wq", "bq", "wk", "bk", "wv", "bv",
        "wo", "bo", "g12", "b12",
        "w11", "b11", "w12", "b12f",
    ]
    param_list = [prepped[name] for name in param_order]
    param_specs = [
        pl.BlockSpec(p.shape, lambda i, _n=p.ndim: (0,) * _n) for p in param_list
    ]

    out = pl.pallas_call(
        functools.partial(cross_transformer_kernel, nhead=nhead,
                          batch_tile=batch_tile, n1=N1, n2=N2),
        out_shape=jax.ShapeDtypeStruct((B * N1, C), f32),
        grid=(num_tiles,),
        in_specs=[
            pl.BlockSpec((rows1, Cin), lambda i: (i, 0)),
            pl.BlockSpec((rows2, Cin), lambda i: (i, 0)),
            *param_specs,
        ],
        out_specs=pl.BlockSpec((rows1, C), lambda i: (i, 0)),
        compiler_params=pltpu.CompilerParams(
            dimension_semantics=("parallel",),   # shards batch tiles across v7x TCs
        ),
    )(x1, x2, *param_list)

    # (B*N1, C) -> (B, C, N1)
    return jnp.transpose(out.reshape(B, N1, C), (0, 2, 1))


# -----------------------------------------------------------------------------
# Pure-JAX reference (full f32, for numerical check)
# -----------------------------------------------------------------------------
def reference_forward(src1, src2, p, nhead=4):
    def ln(x, g, b):
        mu = x.mean(-1, keepdims=True)
        var = ((x - mu) ** 2).mean(-1, keepdims=True)
        return (x - mu) / jnp.sqrt(var + 1e-5) * g[0] + b[0]

    def proj(x):  # (B, Cin, N) -> (B, N, C)
        return jnp.einsum("bcn,oc->bno", x, p["wp"]) + p["bp"][0]

    h1 = ln(proj(src1), p["g13"], p["b13"])
    h2 = ln(proj(src2), p["g13"], p["b13"])
    B, N1, C = h1.shape
    N2 = h2.shape[1]
    dh = C // nhead

    q = h1 @ p["wq"].T + p["bq"][0]
    k = h2 @ p["wk"].T + p["bk"][0]
    v = h2 @ p["wv"].T + p["bv"][0]
    qh = q.reshape(B, N1, nhead, dh).transpose(0, 2, 1, 3)
    kh = k.reshape(B, N2, nhead, dh).transpose(0, 2, 1, 3)
    vh = v.reshape(B, N2, nhead, dh).transpose(0, 2, 1, 3)
    s = jnp.einsum("bhqd,bhkd->bhqk", qh, kh) / math.sqrt(dh)
    a = jax.nn.softmax(s, axis=-1)
    o = jnp.einsum("bhqk,bhkd->bhqd", a, vh).transpose(0, 2, 1, 3).reshape(B, N1, C)
    o = o @ p["wo"].T + p["bo"][0]

    y = ln(h1 + o, p["g12"], p["b12"])
    ff = y @ p["w11"].T + p["b11"][0]
    ff = jax.nn.gelu(ff, approximate=False)
    ff = ff @ p["w12"].T + p["b12f"][0]
    return (y + ff).transpose(0, 2, 1)


# -----------------------------------------------------------------------------
# Main
# -----------------------------------------------------------------------------
if __name__ == "__main__":
    # Small, lane-friendly configuration consistent with the module.
    d_model = 128          # Conv1d in-channels
    d_model_out = 128      # model width C
    nhead = 4
    dim_ff = 256
    B, N1, N2 = 2, 8, 16   # N2 > N1

    key = jax.random.PRNGKey(0)
    keys = jax.random.split(key, 32)
    ki = iter(keys)

    def rnd(shape, scale=0.05):
        return (scale * jax.random.normal(next(ki), shape)).astype(jnp.float32)

    params = {
        # input_proj: Conv1d(d_model, d_model_out, kernel_size=1)
        "wp": rnd((d_model_out, d_model)),
        "bp": rnd((1, d_model_out)),
        # norm13 / norm12 (LayerNorm affine)
        "g13": jnp.ones((1, d_model_out), jnp.float32),
        "b13": jnp.zeros((1, d_model_out), jnp.float32),
        "g12": jnp.ones((1, d_model_out), jnp.float32),
        "b12": jnp.zeros((1, d_model_out), jnp.float32),
        # MultiheadAttention in_proj (split into q/k/v) and out_proj
        "wq": rnd((d_model_out, d_model_out)),
        "bq": rnd((1, d_model_out)),
        "wk": rnd((d_model_out, d_model_out)),
        "bk": rnd((1, d_model_out)),
        "wv": rnd((d_model_out, d_model_out)),
        "bv": rnd((1, d_model_out)),
        "wo": rnd((d_model_out, d_model_out)),
        "bo": rnd((1, d_model_out)),
        # feed-forward
        "w11": rnd((dim_ff, d_model_out)),
        "b11": rnd((1, dim_ff)),
        "w12": rnd((d_model_out, dim_ff)),
        "b12f": rnd((1, d_model_out)),
    }

    src1 = jax.random.normal(next(ki), (B, d_model, N1), dtype=jnp.float32)
    src2 = jax.random.normal(next(ki), (B, d_model, N2), dtype=jnp.float32)

    out = cross_transformer_forward(src1, src2, params, nhead=nhead)
    out = jax.block_until_ready(out)

    ref = jax.block_until_ready(reference_forward(src1, src2, params, nhead=nhead))
    assert out.shape == (B, d_model_out, N1), out.shape
    # Tolerance deliberately loosened from 1e-4: matmuls now run in bf16 on the
    # MXU (f32 accumulation) and the softmax uses the approx EUP reciprocal.
    max_err = float(jnp.max(jnp.abs(out - ref)))
    assert jnp.allclose(out, ref, atol=5e-2, rtol=5e-2), max_err

    print("KERNEL_OK")
</pallas_src>

<mosaic_0001>
module attributes {stable_mosaic.version = 11 : i64} {
  func.func @cross_transformer_kernel(%arg0: i32, %arg1: memref<16x128xbf16, #tpu.memory_space<vmem>>, %arg2: memref<32x128xbf16, #tpu.memory_space<vmem>>, %arg3: memref<128x128xbf16, #tpu.memory_space<vmem>>, %arg4: memref<1x128xf32, #tpu.memory_space<vmem>>, %arg5: memref<1x128xf32, #tpu.memory_space<vmem>>, %arg6: memref<1x128xf32, #tpu.memory_space<vmem>>, %arg7: memref<128x128xbf16, #tpu.memory_space<vmem>>, %arg8: memref<1x128xf32, #tpu.memory_space<vmem>>, %arg9: memref<128x128xbf16, #tpu.memory_space<vmem>>, %arg10: memref<1x128xf32, #tpu.memory_space<vmem>>, %arg11: memref<128x128xbf16, #tpu.memory_space<vmem>>, %arg12: memref<1x128xf32, #tpu.memory_space<vmem>>, %arg13: memref<128x128xbf16, #tpu.memory_space<vmem>>, %arg14: memref<1x128xf32, #tpu.memory_space<vmem>>, %arg15: memref<1x128xf32, #tpu.memory_space<vmem>>, %arg16: memref<1x128xf32, #tpu.memory_space<vmem>>, %arg17: memref<128x256xbf16, #tpu.memory_space<vmem>>, %arg18: memref<1x256xf32, #tpu.memory_space<vmem>>, %arg19: memref<256x128xbf16, #tpu.memory_space<vmem>>, %arg20: memref<1x128xf32, #tpu.memory_space<vmem>>, %arg21: memref<16x128xf32, #tpu.memory_space<vmem>>) attributes {dimension_semantics = [#tpu.dimension_semantics<parallel>], iteration_bounds = array<i64: 1>, scalar_prefetch = 0 : i64, scratch_operands = 0 : i64, tpu.core_type = #tpu.core_type<tc>, window_params = [{transform_indices = @transform_0, window_bounds = array<i64: 16, 128>}, {transform_indices = @transform_1, window_bounds = array<i64: 32, 128>}, {pipeline_mode = #tpu.pipeline_mode<synchronous>, transform_indices = @transform_2, window_bounds = array<i64: 128, 128>}, {pipeline_mode = #tpu.pipeline_mode<synchronous>, transform_indices = @transform_3, window_bounds = array<i64: 1, 128>}, {pipeline_mode = #tpu.pipeline_mode<synchronous>, transform_indices = @transform_4, window_bounds = array<i64: 1, 128>}, {pipeline_mode = #tpu.pipeline_mode<synchronous>, transform_indices = @transform_5, window_bounds = array<i64: 1, 128>}, {pipeline_mode = #tpu.pipeline_mode<synchronous>, transform_indices = @transform_6, window_bounds = array<i64: 128, 128>}, {pipeline_mode = #tpu.pipeline_mode<synchronous>, transform_indices = @transform_7, window_bounds = array<i64: 1, 128>}, {pipeline_mode = #tpu.pipeline_mode<synchronous>, transform_indices = @transform_8, window_bounds = array<i64: 128, 128>}, {pipeline_mode = #tpu.pipeline_mode<synchronous>, transform_indices = @transform_9, window_bounds = array<i64: 1, 128>}, {pipeline_mode = #tpu.pipeline_mode<synchronous>, transform_indices = @transform_10, window_bounds = array<i64: 128, 128>}, {pipeline_mode = #tpu.pipeline_mode<synchronous>, transform_indices = @transform_11, window_bounds = array<i64: 1, 128>}, {pipeline_mode = #tpu.pipeline_mode<synchronous>, transform_indices = @transform_12, window_bounds = array<i64: 128, 128>}, {pipeline_mode = #tpu.pipeline_mode<synchronous>, transform_indices = @transform_13, window_bounds = array<i64: 1, 128>}, {pipeline_mode = #tpu.pipeline_mode<synchronous>, transform_indices = @transform_14, window_bounds = array<i64: 1, 128>}, {pipeline_mode = #tpu.pipeline_mode<synchronous>, transform_indices = @transform_15, window_bounds = array<i64: 1, 128>}, {pipeline_mode = #tpu.pipeline_mode<synchronous>, transform_indices = @transform_16, window_bounds = array<i64: 128, 256>}, {pipeline_mode = #tpu.pipeline_mode<synchronous>, transform_indices = @transform_17, window_bounds = array<i64: 1, 256>}, {pipeline_mode = #tpu.pipeline_mode<synchronous>, transform_indices = @transform_18, window_bounds = array<i64: 256, 128>}, {pipeline_mode = #tpu.pipeline_mode<synchronous>, transform_indices = @transform_19, window_bounds = array<i64: 1, 128>}, {transform_indices = @transform_20, window_bounds = array<i64: 16, 128>}]} {
    %c0 = arith.constant 0 : index
    %c0_0 = arith.constant 0 : index
    %0 = vector.load %arg1[%c0, %c0_0] : memref<16x128xbf16, #tpu.memory_space<vmem>>, vector<16x128xbf16>
    %c0_1 = arith.constant 0 : index
    %c0_2 = arith.constant 0 : index
    %1 = vector.load %arg2[%c0_1, %c0_2] : memref<32x128xbf16, #tpu.memory_space<vmem>>, vector<32x128xbf16>
    %c0_3 = arith.constant 0 : index
    %c0_4 = arith.constant 0 : index
    %2 = vector.load %arg3[%c0_3, %c0_4] : memref<128x128xbf16, #tpu.memory_space<vmem>>, vector<128x128xbf16>
    %c0_5 = arith.constant 0 : index
    %c0_6 = arith.constant 0 : index
    %3 = vector.load %arg4[%c0_5, %c0_6] : memref<1x128xf32, #tpu.memory_space<vmem>>, vector<1x128xf32>
    %cst = arith.constant dense<0.000000e+00> : vector<16x128xf32>
    %4 = tpu.matmul %0, %2, %cst {dimension_numbers = #tpu.dot_dimension_numbers<[1], [0], [0], [1], [0, 0, 1, 1], [], []>} : vector<16x128xbf16>, vector<128x128xbf16>, vector<16x128xf32> -> vector<16x128xf32>
    %5 = vector.broadcast %3 : vector<1x128xf32> to vector<16x128xf32>
    %6 = arith.addf %4, %5 : vector<16x128xf32>
    %cst_7 = arith.constant dense<0.000000e+00> : vector<32x128xf32>
    %7 = tpu.matmul %1, %2, %cst_7 {dimension_numbers = #tpu.dot_dimension_numbers<[1], [0], [0], [1], [0, 0, 1, 1], [], []>} : vector<32x128xbf16>, vector<128x128xbf16>, vector<32x128xf32> -> vector<32x128xf32>
    %8 = vector.broadcast %3 : vector<1x128xf32> to vector<32x128xf32>
    %9 = arith.addf %7, %8 : vector<32x128xf32>
    %c0_8 = arith.constant 0 : index
    %c0_9 = arith.constant 0 : index
    %10 = vector.load %arg5[%c0_8, %c0_9] : memref<1x128xf32, #tpu.memory_space<vmem>>, vector<1x128xf32>
    %c0_10 = arith.constant 0 : index
    %c0_11 = arith.constant 0 : index
    %11 = vector.load %arg6[%c0_10, %c0_11] : memref<1x128xf32, #tpu.memory_space<vmem>>, vector<1x128xf32>
    %cst_12 = arith.constant dense<0.000000e+00> : vector<16xf32>
    %12 = vector.multi_reduction <add>, %6, %cst_12 [1] : vector<16x128xf32> to vector<16xf32>
    %13 = vector.shape_cast %12 : vector<16xf32> to vector<16x1xf32>
    %cst_13 = arith.constant 1.280000e+02 : f32
    %14 = vector.broadcast %cst_13 : f32 to vector<16x1xf32>
    %15 = arith.divf %13, %14 : vector<16x1xf32>
    %16 = arith.mulf %6, %6 : vector<16x128xf32>
    %cst_14 = arith.constant dense<0.000000e+00> : vector<16xf32>
    %17 = vector.multi_reduction <add>, %16, %cst_14 [1] : vector<16x128xf32> to vector<16xf32>
    %18 = vector.shape_cast %17 : vector<16xf32> to vector<16x1xf32>
    %cst_15 = arith.constant 1.280000e+02 : f32
    %19 = vector.broadcast %cst_15 : f32 to vector<16x1xf32>
    %20 = arith.divf %18, %19 : vector<16x1xf32>
    %21 = arith.mulf %15, %15 : vector<16x1xf32>
    %22 = arith.subf %20, %21 : vector<16x1xf32>
    %23 = vector.broadcast %15 : vector<16x1xf32> to vector<16x128xf32>
    %24 = arith.subf %6, %23 : vector<16x128xf32>
    %cst_16 = arith.constant 9.99999974E-6 : f32
    %25 = vector.broadcast %cst_16 : f32 to vector<16x1xf32>
    %26 = arith.addf %22, %25 : vector<16x1xf32>
    %27 = math.rsqrt %26 : vector<16x1xf32>
    %28 = vector.broadcast %27 : vector<16x1xf32> to vector<16x128xf32>
    %29 = arith.mulf %24, %28 : vector<16x128xf32>
    %30 = vector.broadcast %10 : vector<1x128xf32> to vector<16x128xf32>
    %31 = arith.mulf %29, %30 : vector<16x128xf32>
    %32 = vector.broadcast %11 : vector<1x128xf32> to vector<16x128xf32>
    %33 = arith.addf %31, %32 : vector<16x128xf32>
    %cst_17 = arith.constant dense<0.000000e+00> : vector<32xf32>
    %34 = vector.multi_reduction <add>, %9, %cst_17 [1] : vector<32x128xf32> to vector<32xf32>
    %35 = vector.shape_cast %34 : vector<32xf32> to vector<32x1xf32>
    %cst_18 = arith.constant 1.280000e+02 : f32
    %36 = vector.broadcast %cst_18 : f32 to vector<32x1xf32>
    %37 = arith.divf %35, %36 : vector<32x1xf32>
    %38 = arith.mulf %9, %9 : vector<32x128xf32>
    %cst_19 = arith.constant dense<0.000000e+00> : vector<32xf32>
    %39 = vector.multi_reduction <add>, %38, %cst_19 [1] : vector<32x128xf32> to vector<32xf32>
    %40 = vector.shape_cast %39 : vector<32xf32> to vector<32x1xf32>
    %cst_20 = arith.constant 1.280000e+02 : f32
    %41 = vector.broadcast %cst_20 : f32 to vector<32x1xf32>
    %42 = arith.divf %40, %41 : vector<32x1xf32>
    %43 = arith.mulf %37, %37 : vector<32x1xf32>
    %44 = arith.subf %42, %43 : vector<32x1xf32>
    %45 = vector.broadcast %37 : vector<32x1xf32> to vector<32x128xf32>
    %46 = arith.subf %9, %45 : vector<32x128xf32>
    %cst_21 = arith.constant 9.99999974E-6 : f32
    %47 = vector.broadcast %cst_21 : f32 to vector<32x1xf32>
    %48 = arith.addf %44, %47 : vector<32x1xf32>
    %49 = math.rsqrt %48 : vector<32x1xf32>
    %50 = vector.broadcast %49 : vector<32x1xf32> to vector<32x128xf32>
    %51 = arith.mulf %46, %50 : vector<32x128xf32>
    %52 = vector.broadcast %10 : vector<1x128xf32> to vector<32x128xf32>
    %53 = arith.mulf %51, %52 : vector<32x128xf32>
    %54 = vector.broadcast %11 : vector<1x128xf32> to vector<32x128xf32>
    %55 = arith.addf %53, %54 : vector<32x128xf32>
    %56 = arith.truncf %33 : vector<16x128xf32> to vector<16x128xbf16>
    %57 = arith.truncf %55 : vector<32x128xf32> to vector<32x128xbf16>
    %c0_22 = arith.constant 0 : index
    %c0_23 = arith.constant 0 : index
    %58 = vector.load %arg7[%c0_22, %c0_23] : memref<128x128xbf16, #tpu.memory_space<vmem>>, vector<128x128xbf16>
    %cst_24 = arith.constant dense<0.000000e+00> : vector<16x128xf32>
    %59 = tpu.matmul %56, %58, %cst_24 {dimension_numbers = #tpu.dot_dimension_numbers<[1], [0], [0], [1], [0, 0, 1, 1], [], []>} : vector<16x128xbf16>, vector<128x128xbf16>, vector<16x128xf32> -> vector<16x128xf32>
    %c0_25 = arith.constant 0 : index
    %c0_26 = arith.constant 0 : index
    %60 = vector.load %arg8[%c0_25, %c0_26] : memref<1x128xf32, #tpu.memory_space<vmem>>, vector<1x128xf32>
    %61 = vector.broadcast %60 : vector<1x128xf32> to vector<16x128xf32>
    %62 = arith.addf %59, %61 : vector<16x128xf32>
    %c0_27 = arith.constant 0 : index
    %c0_28 = arith.constant 0 : index
    %63 = vector.load %arg9[%c0_27, %c0_28] : memref<128x128xbf16, #tpu.memory_space<vmem>>, vector<128x128xbf16>
    %cst_29 = arith.constant dense<0.000000e+00> : vector<32x128xf32>
    %64 = tpu.matmul %57, %63, %cst_29 {dimension_numbers = #tpu.dot_dimension_numbers<[1], [0], [0], [1], [0, 0, 1, 1], [], []>} : vector<32x128xbf16>, vector<128x128xbf16>, vector<32x128xf32> -> vector<32x128xf32>
    %c0_30 = arith.constant 0 : index
    %c0_31 = arith.constant 0 : index
    %65 = vector.load %arg10[%c0_30, %c0_31] : memref<1x128xf32, #tpu.memory_space<vmem>>, vector<1x128xf32>
    %66 = vector.broadcast %65 : vector<1x128xf32> to vector<32x128xf32>
    %67 = arith.addf %64, %66 : vector<32x128xf32>
    %c0_32 = arith.constant 0 : index
    %c0_33 = arith.constant 0 : index
    %68 = vector.load %arg11[%c0_32, %c0_33] : memref<128x128xbf16, #tpu.memory_space<vmem>>, vector<128x128xbf16>
    %cst_34 = arith.constant dense<0.000000e+00> : vector<32x128xf32>
    %69 = tpu.matmul %57, %68, %cst_34 {dimension_numbers = #tpu.dot_dimension_numbers<[1], [0], [0], [1], [0, 0, 1, 1], [], []>} : vector<32x128xbf16>, vector<128x128xbf16>, vector<32x128xf32> -> vector<32x128xf32>
    %c0_35 = arith.constant 0 : index
    %c0_36 = arith.constant 0 : index
    %70 = vector.load %arg12[%c0_35, %c0_36] : memref<1x128xf32, #tpu.memory_space<vmem>>, vector<1x128xf32>
    %71 = vector.broadcast %70 : vector<1x128xf32> to vector<32x128xf32>
    %72 = arith.addf %69, %71 : vector<32x128xf32>
    %73 = vector.extract_strided_slice %62 {offsets = [0, 0], sizes = [8, 128], strides = [1, 1]} : vector<16x128xf32> to vector<8x128xf32>
    %cst_37 = arith.constant 0.176776692 : f32
    %74 = vector.broadcast %cst_37 : f32 to vector<8x128xf32>
    %75 = arith.mulf %73, %74 : vector<8x128xf32>
    %76 = vector.extract_strided_slice %67 {offsets = [0, 0], sizes = [16, 128], strides = [1, 1]} : vector<32x128xf32> to vector<16x128xf32>
    %77 = vector.extract_strided_slice %72 {offsets = [0, 0], sizes = [16, 128], strides = [1, 1]} : vector<32x128xf32> to vector<16x128xf32>
    %78 = vector.shape_cast %75 : vector<8x128xf32> to vector<8x4x32xf32>
    %79 = tpu.transpose %78, [1, 0, 2] : vector<8x4x32xf32> -> vector<4x8x32xf32>
    %80 = arith.truncf %79 : vector<4x8x32xf32> to vector<4x8x32xbf16>
    %81 = vector.shape_cast %76 : vector<16x128xf32> to vector<16x4x32xf32>
    %82 = tpu.transpose %81, [1, 0, 2] : vector<16x4x32xf32> -> vector<4x16x32xf32>
    %83 = arith.truncf %82 : vector<4x16x32xf32> to vector<4x16x32xbf16>
    %84 = vector.shape_cast %77 : vector<16x128xf32> to vector<16x4x32xf32>
    %85 = tpu.transpose %84, [1, 0, 2] : vector<16x4x32xf32> -> vector<4x16x32xf32>
    %86 = arith.truncf %85 : vector<4x16x32xf32> to vector<4x16x32xbf16>
    "tpu.trace_start"() <{level = 10 : i32, message = "hqd,hkd->hqk"}> : () -> ()
    %cst_38 = arith.constant dense<0.000000e+00> : vector<4x8x16xf32>
    %87 = tpu.matmul %80, %83, %cst_38 {dimension_numbers = #tpu.dot_dimension_numbers<[2], [2], [1], [1], [0, 0, 0, 1, 1, 1], [0], [0]>} : vector<4x8x32xbf16>, vector<4x16x32xbf16>, vector<4x8x16xf32> -> vector<4x8x16xf32>
    "tpu.trace_stop"() : () -> ()
    %cst_39 = arith.constant dense<0xFF800000> : vector<4x8xf32>
    %88 = vector.multi_reduction <maximumf>, %87, %cst_39 [2] : vector<4x8x16xf32> to vector<4x8xf32>
    %89 = vector.shape_cast %88 : vector<4x8xf32> to vector<4x8x1xf32>
    %90 = vector.broadcast %89 : vector<4x8x1xf32> to vector<4x8x16xf32>
    %91 = arith.subf %87, %90 : vector<4x8x16xf32>
    %92 = math.exp %91 : vector<4x8x16xf32>
    %cst_40 = arith.constant dense<0.000000e+00> : vector<4x8xf32>
    %93 = vector.multi_reduction <add>, %92, %cst_40 [2] : vector<4x8x16xf32> to vector<4x8xf32>
    %94 = vector.shape_cast %93 : vector<4x8xf32> to vector<4x8x1xf32>
    %95 = tpu.reciprocal %94 {approx = true} : vector<4x8x1xf32> -> vector<4x8x1xf32>
    %96 = vector.broadcast %95 : vector<4x8x1xf32> to vector<4x8x16xf32>
    %97 = arith.mulf %92, %96 : vector<4x8x16xf32>
    %98 = arith.truncf %97 : vector<4x8x16xf32> to vector<4x8x16xbf16>
    "tpu.trace_start"() <{level = 10 : i32, message = "hqk,hkd->hqd"}> : () -> ()
    %cst_41 = arith.constant dense<0.000000e+00> : vector<4x8x32xf32>
    %99 = tpu.matmul %98, %86, %cst_41 {dimension_numbers = #tpu.dot_dimension_numbers<[2], [1], [1], [2], [0, 0, 0, 1, 1, 2], [0], [0]>} : vector<4x8x16xbf16>, vector<4x16x32xbf16>, vector<4x8x32xf32> -> vector<4x8x32xf32>
    "tpu.trace_stop"() : () -> ()
    %100 = tpu.transpose %99, [1, 0, 2] : vector<4x8x32xf32> -> vector<8x4x32xf32>
    %101 = vector.shape_cast %100 : vector<8x4x32xf32> to vector<8x128xf32>
    %102 = vector.extract_strided_slice %62 {offsets = [8, 0], sizes = [8, 128], strides = [1, 1]} : vector<16x128xf32> to vector<8x128xf32>
    %cst_42 = arith.constant 0.176776692 : f32
    %103 = vector.broadcast %cst_42 : f32 to vector<8x128xf32>
    %104 = arith.mulf %102, %103 : vector<8x128xf32>
    %105 = vector.extract_strided_slice %67 {offsets = [16, 0], sizes = [16, 128], strides = [1, 1]} : vector<32x128xf32> to vector<16x128xf32>
    %106 = vector.extract_strided_slice %72 {offsets = [16, 0], sizes = [16, 128], strides = [1, 1]} : vector<32x128xf32> to vector<16x128xf32>
    %107 = vector.shape_cast %104 : vector<8x128xf32> to vector<8x4x32xf32>
    %108 = tpu.transpose %107, [1, 0, 2] : vector<8x4x32xf32> -> vector<4x8x32xf32>
    %109 = arith.truncf %108 : vector<4x8x32xf32> to vector<4x8x32xbf16>
    %110 = vector.shape_cast %105 : vector<16x128xf32> to vector<16x4x32xf32>
    %111 = tpu.transpose %110, [1, 0, 2] : vector<16x4x32xf32> -> vector<4x16x32xf32>
    %112 = arith.truncf %111 : vector<4x16x32xf32> to vector<4x16x32xbf16>
    %113 = vector.shape_cast %106 : vector<16x128xf32> to vector<16x4x32xf32>
    %114 = tpu.transpose %113, [1, 0, 2] : vector<16x4x32xf32> -> vector<4x16x32xf32>
    %115 = arith.truncf %114 : vector<4x16x32xf32> to vector<4x16x32xbf16>
    "tpu.trace_start"() <{level = 10 : i32, message = "hqd,hkd->hqk"}> : () -> ()
    %cst_43 = arith.constant dense<0.000000e+00> : vector<4x8x16xf32>
    %116 = tpu.matmul %109, %112, %cst_43 {dimension_numbers = #tpu.dot_dimension_numbers<[2], [2], [1], [1], [0, 0, 0, 1, 1, 1], [0], [0]>} : vector<4x8x32xbf16>, vector<4x16x32xbf16>, vector<4x8x16xf32> -> vector<4x8x16xf32>
    "tpu.trace_stop"() : () -> ()
    %cst_44 = arith.constant dense<0xFF800000> : vector<4x8xf32>
    %117 = vector.multi_reduction <maximumf>, %116, %cst_44 [2] : vector<4x8x16xf32> to vector<4x8xf32>
    %118 = vector.shape_cast %117 : vector<4x8xf32> to vector<4x8x1xf32>
    %119 = vector.broadcast %118 : vector<4x8x1xf32> to vector<4x8x16xf32>
    %120 = arith.subf %116, %119 : vector<4x8x16xf32>
    %121 = math.exp %120 : vector<4x8x16xf32>
    %cst_45 = arith.constant dense<0.000000e+00> : vector<4x8xf32>
    %122 = vector.multi_reduction <add>, %121, %cst_45 [2] : vector<4x8x16xf32> to vector<4x8xf32>
    %123 = vector.shape_cast %122 : vector<4x8xf32> to vector<4x8x1xf32>
    %124 = tpu.reciprocal %123 {approx = true} : vector<4x8x1xf32> -> vector<4x8x1xf32>
    %125 = vector.broadcast %124 : vector<4x8x1xf32> to vector<4x8x16xf32>
    %126 = arith.mulf %121, %125 : vector<4x8x16xf32>
    %127 = arith.truncf %126 : vector<4x8x16xf32> to vector<4x8x16xbf16>
    "tpu.trace_start"() <{level = 10 : i32, message = "hqk,hkd->hqd"}> : () -> ()
    %cst_46 = arith.constant dense<0.000000e+00> : vector<4x8x32xf32>
    %128 = tpu.matmul %127, %115, %cst_46 {dimension_numbers = #tpu.dot_dimension_numbers<[2], [1], [1], [2], [0, 0, 0, 1, 1, 2], [0], [0]>} : vector<4x8x16xbf16>, vector<4x16x32xbf16>, vector<4x8x32xf32> -> vector<4x8x32xf32>
    "tpu.trace_stop"() : () -> ()
    %129 = tpu.transpose %128, [1, 0, 2] : vector<4x8x32xf32> -> vector<8x4x32xf32>
    %130 = vector.shape_cast %129 : vector<8x4x32xf32> to vector<8x128xf32>
    %131 = tpu.concatenate %101, %130 in 0 : vector<8x128xf32>, vector<8x128xf32> -> vector<16x128xf32>
    %132 = arith.truncf %131 : vector<16x128xf32> to vector<16x128xbf16>
    %c0_47 = arith.constant 0 : index
    %c0_48 = arith.constant 0 : index
    %133 = vector.load %arg13[%c0_47, %c0_48] : memref<128x128xbf16, #tpu.memory_space<vmem>>, vector<128x128xbf16>
    %cst_49 = arith.constant dense<0.000000e+00> : vector<16x128xf32>
    %134 = tpu.matmul %132, %133, %cst_49 {dimension_numbers = #tpu.dot_dimension_numbers<[1], [0], [0], [1], [0, 0, 1, 1], [], []>} : vector<16x128xbf16>, vector<128x128xbf16>, vector<16x128xf32> -> vector<16x128xf32>
    %c0_50 = arith.constant 0 : index
    %c0_51 = arith.constant 0 : index
    %135 = vector.load %arg14[%c0_50, %c0_51] : memref<1x128xf32, #tpu.memory_space<vmem>>, vector<1x128xf32>
    %136 = vector.broadcast %135 : vector<1x128xf32> to vector<16x128xf32>
    %137 = arith.addf %134, %136 : vector<16x128xf32>
    %138 = arith.addf %33, %137 : vector<16x128xf32>
    %c0_52 = arith.constant 0 : index
    %c0_53 = arith.constant 0 : index
    %139 = vector.load %arg15[%c0_52, %c0_53] : memref<1x128xf32, #tpu.memory_space<vmem>>, vector<1x128xf32>
    %c0_54 = arith.constant 0 : index
    %c0_55 = arith.constant 0 : index
    %140 = vector.load %arg16[%c0_54, %c0_55] : memref<1x128xf32, #tpu.memory_space<vmem>>, vector<1x128xf32>
    %cst_56 = arith.constant dense<0.000000e+00> : vector<16xf32>
    %141 = vector.multi_reduction <add>, %138, %cst_56 [1] : vector<16x128xf32> to vector<16xf32>
    %142 = vector.shape_cast %141 : vector<16xf32> to vector<16x1xf32>
    %cst_57 = arith.constant 1.280000e+02 : f32
    %143 = vector.broadcast %cst_57 : f32 to vector<16x1xf32>
    %144 = arith.divf %142, %143 : vector<16x1xf32>
    %145 = arith.mulf %138, %138 : vector<16x128xf32>
    %cst_58 = arith.constant dense<0.000000e+00> : vector<16xf32>
    %146 = vector.multi_reduction <add>, %145, %cst_58 [1] : vector<16x128xf32> to vector<16xf32>
    %147 = vector.shape_cast %146 : vector<16xf32> to vector<16x1xf32>
    %cst_59 = arith.constant 1.280000e+02 : f32
    %148 = vector.broadcast %cst_59 : f32 to vector<16x1xf32>
    %149 = arith.divf %147, %148 : vector<16x1xf32>
    %150 = arith.mulf %144, %144 : vector<16x1xf32>
    %151 = arith.subf %149, %150 : vector<16x1xf32>
    %152 = vector.broadcast %144 : vector<16x1xf32> to vector<16x128xf32>
    %153 = arith.subf %138, %152 : vector<16x128xf32>
    %cst_60 = arith.constant 9.99999974E-6 : f32
    %154 = vector.broadcast %cst_60 : f32 to vector<16x1xf32>
    %155 = arith.addf %151, %154 : vector<16x1xf32>
    %156 = math.rsqrt %155 : vector<16x1xf32>
    %157 = vector.broadcast %156 : vector<16x1xf32> to vector<16x128xf32>
    %158 = arith.mulf %153, %157 : vector<16x128xf32>
    %159 = vector.broadcast %139 : vector<1x128xf32> to vector<16x128xf32>
    %160 = arith.mulf %158, %159 : vector<16x128xf32>
    %161 = vector.broadcast %140 : vector<1x128xf32> to vector<16x128xf32>
    %162 = arith.addf %160, %161 : vector<16x128xf32>
    %163 = arith.truncf %162 : vector<16x128xf32> to vector<16x128xbf16>
    %c0_61 = arith.constant 0 : index
    %c0_62 = arith.constant 0 : index
    %164 = vector.load %arg17[%c0_61, %c0_62] : memref<128x256xbf16, #tpu.memory_space<vmem>>, vector<128x256xbf16>
    %cst_63 = arith.constant dense<0.000000e+00> : vector<16x256xf32>
    %165 = tpu.matmul %163, %164, %cst_63 {dimension_numbers = #tpu.dot_dimension_numbers<[1], [0], [0], [1], [0, 0, 1, 1], [], []>} : vector<16x128xbf16>, vector<128x256xbf16>, vector<16x256xf32> -> vector<16x256xf32>
    %c0_64 = arith.constant 0 : index
    %c0_65 = arith.constant 0 : index
    %166 = vector.load %arg18[%c0_64, %c0_65] : memref<1x256xf32, #tpu.memory_space<vmem>>, vector<1x256xf32>
    %167 = vector.broadcast %166 : vector<1x256xf32> to vector<16x256xf32>
    %168 = arith.addf %165, %167 : vector<16x256xf32>
    %cst_66 = arith.constant 5.000000e-01 : f32
    %169 = vector.broadcast %cst_66 : f32 to vector<16x256xf32>
    %170 = arith.mulf %169, %168 : vector<16x256xf32>
    %cst_67 = arith.constant 0.707106769 : f32
    %171 = vector.broadcast %cst_67 : f32 to vector<16x256xf32>
    %172 = arith.mulf %168, %171 : vector<16x256xf32>
    %173 = math.erf %172 : vector<16x256xf32>
    %cst_68 = arith.constant 1.000000e+00 : f32
    %174 = vector.broadcast %cst_68 : f32 to vector<16x256xf32>
    %175 = arith.addf %174, %173 : vector<16x256xf32>
    %176 = arith.mulf %170, %175 : vector<16x256xf32>
    %177 = arith.truncf %176 : vector<16x256xf32> to vector<16x256xbf16>
    %c0_69 = arith.constant 0 : index
    %c0_70 = arith.constant 0 : index
    %178 = vector.load %arg19[%c0_69, %c0_70] : memref<256x128xbf16, #tpu.memory_space<vmem>>, vector<256x128xbf16>
    %cst_71 = arith.constant dense<0.000000e+00> : vector<16x128xf32>
    %179 = tpu.matmul %177, %178, %cst_71 {dimension_numbers = #tpu.dot_dimension_numbers<[1], [0], [0], [1], [0, 0, 1, 1], [], []>} : vector<16x256xbf16>, vector<256x128xbf16>, vector<16x128xf32> -> vector<16x128xf32>
    %c0_72 = arith.constant 0 : index
    %c0_73 = arith.constant 0 : index
    %180 = vector.load %arg20[%c0_72, %c0_73] : memref<1x128xf32, #tpu.memory_space<vmem>>, vector<1x128xf32>
    %181 = vector.broadcast %180 : vector<1x128xf32> to vector<16x128xf32>
    %182 = arith.addf %179, %181 : vector<16x128xf32>
    %183 = arith.addf %162, %182 : vector<16x128xf32>
    %c0_74 = arith.constant 0 : index
    %c0_75 = arith.constant 0 : index
    %184 = vector.load %arg21[%c0_74, %c0_75] : memref<16x128xf32, #tpu.memory_space<vmem>>, vector<16x128xf32>
    tpu.vector_store %arg21[%c0_74, %c0_75], %183 {strides = array<i32>} : memref<16x128xf32, #tpu.memory_space<vmem>>, vector<16x128xf32>,
    return
  }
  func.func @transform_0(%arg0: i32) -> (i32, i32) {
    %c0_i32 = arith.constant 0 : i32
    %c0_i32_0 = arith.constant 0 : i32
    return %arg0, %c0_i32 : i32, i32
  }
  func.func @transform_1(%arg0: i32) -> (i32, i32) {
    %c0_i32 = arith.constant 0 : i32
    %c0_i32_0 = arith.constant 0 : i32
    return %arg0, %c0_i32 : i32, i32
  }
  func.func @transform_2(%arg0: i32) -> (i32, i32) {
    %c0_i32 = arith.constant 0 : i32
    %c0_i32_0 = arith.constant 0 : i32
    %c0_i32_1 = arith.constant 0 : i32
    return %c0_i32, %c0_i32_0 : i32, i32
  }
  func.func @transform_3(%arg0: i32) -> (i32, i32) {
    %c0_i32 = arith.constant 0 : i32
    %c0_i32_0 = arith.constant 0 : i32
    %c0_i32_1 = arith.constant 0 : i32
    return %c0_i32, %c0_i32_0 : i32, i32
  }
  func.func @transform_4(%arg0: i32) -> (i32, i32) {
    %c0_i32 = arith.constant 0 : i32
    %c0_i32_0 = arith.constant 0 : i32
    %c0_i32_1 = arith.constant 0 : i32
    return %c0_i32, %c0_i32_0 : i32, i32
  }
  func.func @transform_5(%arg0: i32) -> (i32, i32) {
    %c0_i32 = arith.constant 0 : i32
    %c0_i32_0 = arith.constant 0 : i32
    %c0_i32_1 = arith.constant 0 : i32
    return %c0_i32, %c0_i32_0 : i32, i32
  }
  func.func @transform_6(%arg0: i32) -> (i32, i32) {
    %c0_i32 = arith.constant 0 : i32
    %c0_i32_0 = arith.constant 0 : i32
    %c0_i32_1 = arith.constant 0 : i32
    return %c0_i32, %c0_i32_0 : i32, i32
  }
  func.func @transform_7(%arg0: i32) -> (i32, i32) {
    %c0_i32 = arith.constant 0 : i32
    %c0_i32_0 = arith.constant 0 : i32
    %c0_i32_1 = arith.constant 0 : i32
    return %c0_i32, %c0_i32_0 : i32, i32
  }
  func.func @transform_8(%arg0: i32) -> (i32, i32) {
    %c0_i32 = arith.constant 0 : i32
    %c0_i32_0 = arith.constant 0 : i32
    %c0_i32_1 = arith.constant 0 : i32
    return %c0_i32, %c0_i32_0 : i32, i32
  }
  func.func @transform_9(%arg0: i32) -> (i32, i32) {
    %c0_i32 = arith.constant 0 : i32
    %c0_i32_0 = arith.constant 0 : i32
    %c0_i32_1 = arith.constant 0 : i32
    return %c0_i32, %c0_i32_0 : i32, i32
  }
  func.func @transform_10(%arg0: i32) -> (i32, i32) {
    %c0_i32 = arith.constant 0 : i32
    %c0_i32_0 = arith.constant 0 : i32
    %c0_i32_1 = arith.constant 0 : i32
    return %c0_i32, %c0_i32_0 : i32, i32
  }
  func.func @transform_11(%arg0: i32) -> (i32, i32) {
    %c0_i32 = arith.constant 0 : i32
    %c0_i32_0 = arith.constant 0 : i32
    %c0_i32_1 = arith.constant 0 : i32
    return %c0_i32, %c0_i32_0 : i32, i32
  }
  func.func @transform_12(%arg0: i32) -> (i32, i32) {
    %c0_i32 = arith.constant 0 : i32
    %c0_i32_0 = arith.constant 0 : i32
    %c0_i32_1 = arith.constant 0 : i32
    return %c0_i32, %c0_i32_0 : i32, i32
  }
  func.func @transform_13(%arg0: i32) -> (i32, i32) {
    %c0_i32 = arith.constant 0 : i32
    %c0_i32_0 = arith.constant 0 : i32
    %c0_i32_1 = arith.constant 0 : i32
    return %c0_i32, %c0_i32_0 : i32, i32
  }
  func.func @transform_14(%arg0: i32) -> (i32, i32) {
    %c0_i32 = arith.constant 0 : i32
    %c0_i32_0 = arith.constant 0 : i32
    %c0_i32_1 = arith.constant 0 : i32
    return %c0_i32, %c0_i32_0 : i32, i32
  }
  func.func @transform_15(%arg0: i32) -> (i32, i32) {
    %c0_i32 = arith.constant 0 : i32
    %c0_i32_0 = arith.constant 0 : i32
    %c0_i32_1 = arith.constant 0 : i32
    return %c0_i32, %c0_i32_0 : i32, i32
  }
  func.func @transform_16(%arg0: i32) -> (i32, i32) {
    %c0_i32 = arith.constant 0 : i32
    %c0_i32_0 = arith.constant 0 : i32
    %c0_i32_1 = arith.constant 0 : i32
    return %c0_i32, %c0_i32_0 : i32, i32
  }
  func.func @transform_17(%arg0: i32) -> (i32, i32) {
    %c0_i32 = arith.constant 0 : i32
    %c0_i32_0 = arith.constant 0 : i32
    %c0_i32_1 = arith.constant 0 : i32
    return %c0_i32, %c0_i32_0 : i32, i32
  }
  func.func @transform_18(%arg0: i32) -> (i32, i32) {
    %c0_i32 = arith.constant 0 : i32
    %c0_i32_0 = arith.constant 0 : i32
    %c0_i32_1 = arith.constant 0 : i32
    return %c0_i32, %c0_i32_0 : i32, i32
  }
  func.func @transform_19(%arg0: i32) -> (i32, i32) {
    %c0_i32 = arith.constant 0 : i32
    %c0_i32_0 = arith.constant 0 : i32
    %c0_i32_1 = arith.constant 0 : i32
    return %c0_i32, %c0_i32_0 : i32, i32
  }
  func.func @transform_20(%arg0: i32) -> (i32, i32) {
    %c0_i32 = arith.constant 0 : i32
    %c0_i32_0 = arith.constant 0 : i32
    return %arg0, %c0_i32 : i32, i32
  }
}

</mosaic_0001>

<bundles_post_ra>
// kernel: tpu_custom_call.1
= control target key start
LH: loop header
LB: loop body
LE: loop exit
PB: predicated region body
PF: predicated region fallthrough
CT: control target
= control target key end

     0   :  { %s5787_s0 = inlined_call_operand.hbm [shape: bf16[16,128], index: 0, kind: input, shape index: {}]   ;;  %s5788_s1 = inlined_call_operand.hbm [shape: bf16[32,128], index: 1, kind: input, shape index: {}]   ;;  %s5789_s2 = inlined_call_operand.hbm [shape: bf16[128,128], index: 2, kind: input, shape index: {}]   ;;  %s5790_s3 = inlined_call_operand.vmem [shape: f32[1,128], index: 3, kind: input, shape index: {}]   ;;  %s5791_s4 = inlined_call_operand.vmem [shape: f32[1,128], index: 4, kind: input, shape index: {}]   ;;  %s5792_s5 = inlined_call_operand.vmem [shape: f32[1,128], index: 5, kind: input, shape index: {}]   ;;  %s5793_s6 = inlined_call_operand.hbm [shape: bf16[128,128], index: 6, kind: input, shape index: {}]   ;;  %s5794_s7 = inlined_call_operand.vmem [shape: f32[1,128], index: 7, kind: input, shape index: {}]   ;;  %s5795_s8 = inlined_call_operand.hbm [shape: bf16[128,128], index: 8, kind: input, shape index: {}]   ;;  %s5796_s9 = inlined_call_operand.vmem [shape: f32[1,128], index: 9, kind: input, shape index: {}]   ;;  %s5797_s10 = inlined_call_operand.hbm [shape: bf16[128,128], index: 10, kind: input, shape index: {}]   ;;  %s5798_s11 = inlined_call_operand.vmem [shape: f32[1,128], index: 11, kind: input, shape index: {}]   ;;  %s5799_s12 = inlined_call_operand.hbm [shape: bf16[128,128], index: 12, kind: input, shape index: {}]   ;;  %s5800_s13 = inlined_call_operand.vmem [shape: f32[1,128], index: 13, kind: input, shape index: {}]   ;;  %s5801_s14 = inlined_call_operand.vmem [shape: f32[1,128], index: 14, kind: input, shape index: {}]   ;;  %s5802_s15 = inlined_call_operand.vmem [shape: f32[1,128], index: 15, kind: input, shape index: {}]   ;;  %s5803_s16 = inlined_call_operand.hbm [shape: bf16[128,256], index: 16, kind: input, shape index: {}]   ;;  %s5804_s17 = inlined_call_operand.vmem [shape: f32[1,256], index: 17, kind: input, shape index: {}]   ;;  %s5805_s18 = inlined_call_operand.hbm [shape: bf16[256,128], index: 18, kind: input, shape index: {}]   ;;  %s5806_s19 = inlined_call_operand.vmem [shape: f32[1,128], index: 19, kind: input, shape index: {}]   ;;  %s5807_s20 = inlined_call_operand.hbm [shape: f32[16,128], index: 20, kind: output, shape index: {}]  }
   0x1   :  { %5814 = sst [smem:[#allocation24_spill]] %s5787_s0 }
   0x2   :  { %5815 = sst [smem:[#allocation25_spill]] %s5788_s1 }
   0x3   :  { %5816 = sst [smem:[#allocation26_spill]] %s5789_s2 }
   0x4   :  { %5817 = sst [smem:[#allocation27_spill]] %s5790_s3 }
   0x5   :  { %5818 = sst [smem:[#allocation28_spill]] %s5791_s4 }
   0x6   :  { %5819 = sst [smem:[#allocation29_spill]] %s5807_s20 }
   0x7   :  { %25 = vsyncpa [#allocation3], 0 }
   0x8   :  { %26 = vsyncpa [#allocation6], 0 }
   0x9   :  { %27 = vsyncpa [#allocation9], 0 }
   0xa   :  { %28 = vsyncpa [#allocation12], 0 }
   0xb   :  { %29 = vsyncpa [#allocation15], 0 }
   0xc   :  { %30 = vsyncpa [#allocation4], 0  ;;  %s4827_s1 = smov [#allocation5]   ;;  %s4828_s23 = smov [#allocation8]  }
   0xd   :  { %s48_s22 = sshll.u32 %s4827_s1, 4  ;;  %s78_s24 = sshll.u32 %s4828_s23, 4  ;;  %s49_s22 = int_to_ptr.vmem [resolvable:$true] %s48_s22  ;;  %s4953_s24 = int_to_ptr.vmem [resolvable:$true] %s78_s24 }
   0xe   :  { %s5820_s3 = sld [smem:[#allocation25_spill]] }
  0x14   :  { %s4595_s26 = scalar_lea.hbm %s5820_s3, 256 }
  0x15   :  { %p4596_p0 = scmp.ne.s32.totalorder %s5820_s3, %s4595_s26  ;;  %p4599_p1 = scmp.lt.u32.totalorder %s4595_s26, %s5820_s3 }
  0x17   :  { %p4601_p2 = pnand %p4599_p1, %p4596_p0 }
  0x19   :  { %4604 = shalt.err (!%p4601_p2)
}
  0x1a   :  { %s4605_s30 = scalar_lea.vmem %s49_s22, 256  ;;  %p4610_p4 = scmp.lt.s32.totalorder %s49_s22, %s49_s22 }
  0x1b   :  { %p4606_p3 = scmp.ne.s32.totalorder %s49_s22, %s4605_s30  ;;  %p4611_p5 = scmp.lt.s32.totalorder %s4605_s30, %s4605_s30 }
  0x1d   :  { %p4612_p6 = por %p4611_p5, %p4610_p4 }
  0x1f   :  { %p4613_p7 = pnand %p4612_p6, %p4606_p3 }
  0x21   :  { %4616 = shalt.err (!%p4613_p7)
}
  0x22   :  { %s5812_s0 = smov 64   ;;  %s4830_s21 = smov 4  }
  0x23   :  { %54 = dma.hbm_to_vmem [thread:$0]  %s5820_s3, 256, %s49_s22, [#allocation6], %s5812_s0, %s5812_s0, %s4830_s21  }
  0x24   :  { %s4617_s26 = scalar_lea.hbm %s5793_s6, 1024 }
  0x25   :  { %p4618_p8 = scmp.ne.s32.totalorder %s5793_s6, %s4617_s26  ;;  %p4621_p9 = scmp.lt.u32.totalorder %s4617_s26, %s5793_s6 }
  0x27   :  { %p4623_p10 = pnand %p4621_p9, %p4618_p8 }
  0x29   :  { %4626 = shalt.err (!%p4623_p10)
}
  0x2a   :  { %s4627_s30 = scalar_lea.vmem %s4953_s24, 1024  ;;  %p4632_p12 = scmp.lt.s32.totalorder %s4953_s24, %s4953_s24 }
  0x2b   :  { %p4628_p11 = scmp.ne.s32.totalorder %s4953_s24, %s4627_s30  ;;  %p4633_p13 = scmp.lt.s32.totalorder %s4627_s30, %s4627_s30 }
  0x2d   :  { %p4634_p0 = por %p4633_p13, %p4632_p12 }
  0x2f   :  { %p4635_p1 = pnand %p4634_p0, %p4628_p11 }
  0x31   :  { %4638 = shalt.err (!%p4635_p1)
}
  0x32   :  { %84 = dma.hbm_to_vmem [thread:$0]  %s5793_s6, 1024, %s4953_s24, [#allocation9], %s5812_s0, %s5812_s0, %s4830_s21  }
  0x33   :  { %s4831_s1 = smov [#allocation11]   ;;  %s4832_s2 = smov [#allocation14]  }
  0x34   :  { %s106_s23 = sshll.u32 %s4831_s1, 4  ;;  %s138_s25 = sshll.u32 %s4832_s2, 4  ;;  %s107_s23 = int_to_ptr.vmem [resolvable:$true] %s106_s23  ;;  %s4990_s25 = int_to_ptr.vmem [resolvable:$true] %s138_s25 }
  0x35   :  { %s4639_s28 = scalar_lea.hbm %s5797_s10, 1024 }
  0x36   :  { %p4640_p2 = scmp.ne.s32.totalorder %s5797_s10, %s4639_s28  ;;  %p4643_p3 = scmp.lt.u32.totalorder %s4639_s28, %s5797_s10 }
  0x38   :  { %p4645_p4 = pnand %p4643_p3, %p4640_p2 }
  0x3a   :  { %4648 = shalt.err (!%p4645_p4)
}
  0x3b   :  { %s4649_s6 = scalar_lea.vmem %s107_s23, 1024  ;;  %p4654_p6 = scmp.lt.s32.totalorder %s107_s23, %s107_s23 }
  0x3c   :  { %p4650_p5 = scmp.ne.s32.totalorder %s107_s23, %s4649_s6  ;;  %p4655_p7 = scmp.lt.s32.totalorder %s4649_s6, %s4649_s6 }
  0x3e   :  { %p4656_p8 = por %p4655_p7, %p4654_p6 }
  0x40   :  { %p4657_p9 = pnand %p4656_p8, %p4650_p5 }
  0x42   :  { %4660 = shalt.err (!%p4657_p9)
}
  0x43   :  { %112 = dma.hbm_to_vmem [thread:$0]  %s5797_s10, 1024, %s107_s23, [#allocation12], %s5812_s0, %s5812_s0, %s4830_s21  }
  0x44   :  { %s4661_s20 = scalar_lea.hbm %s5803_s16, 2048 }
  0x45   :  { %p4662_p10 = scmp.ne.s32.totalorder %s5803_s16, %s4661_s20  ;;  %p4665_p11 = scmp.lt.u32.totalorder %s4661_s20, %s5803_s16 }
  0x47   :  { %p4667_p12 = pnand %p4665_p11, %p4662_p10 }
  0x49   :  { %4670 = shalt.err (!%p4667_p12)
}
  0x4a   :  { %s4671_s4 = scalar_lea.vmem %s4990_s25, 2048  ;;  %p4676_p0 = scmp.lt.s32.totalorder %s4990_s25, %s4990_s25 }
  0x4b   :  { %p4672_p13 = scmp.ne.s32.totalorder %s4990_s25, %s4671_s4  ;;  %p4677_p1 = scmp.lt.s32.totalorder %s4671_s4, %s4671_s4 }
  0x4d   :  { %p4678_p2 = por %p4677_p1, %p4676_p0 }
  0x4f   :  { %p4679_p3 = pnand %p4678_p2, %p4672_p13 }
  0x51   :  { %4682 = shalt.err (!%p4679_p3)
}
  0x52   :  { %s4833_s10 = smov 128   ;;  %s4834_s23 = smov 8  }
  0x53   :  { %144 = dma.hbm_to_vmem [thread:$0]  %s5803_s16, 2048, %s4990_s25, [#allocation15], %s4833_s10, %s4833_s10, %s4834_s23  }
  0x54   :  { %s4835_s6 = smov [#allocation2]   ;;  %s4836_s22 = smov [#allocation7]  }
  0x55   :  { %s36_s24 = sshll.u32 %s4835_s6, 4  ;;  %s60_s3 = sshll.u32 %s4836_s22, 4  ;;  %s37_s24 = int_to_ptr.vmem [resolvable:$true] %s36_s24  ;;  %s5027_s3 = int_to_ptr.vmem [resolvable:$true] %s60_s3 }
  0x56   :  { %s5821_s2 = sld [smem:[#allocation24_spill]] }
  0x5c   :  { %s4683_s26 = scalar_lea.hbm %s5821_s2, 128 }
  0x5d   :  { %p4684_p4 = scmp.ne.s32.totalorder %s5821_s2, %s4683_s26  ;;  %p4687_p5 = scmp.lt.u32.totalorder %s4683_s26, %s5821_s2 }
  0x5f   :  { %p4689_p6 = pnand %p4687_p5, %p4684_p4 }
  0x61   :  { %4692 = shalt.err (!%p4689_p6)
}
  0x62   :  { %s4693_s16 = scalar_lea.vmem %s37_s24, 128  ;;  %p4698_p8 = scmp.lt.s32.totalorder %s37_s24, %s37_s24 }
  0x63   :  { %p4694_p7 = scmp.ne.s32.totalorder %s37_s24, %s4693_s16  ;;  %p4699_p9 = scmp.lt.s32.totalorder %s4693_s16, %s4693_s16 }
  0x65   :  { %p4700_p10 = por %p4699_p9, %p4698_p8 }
  0x67   :  { %p4701_p11 = pnand %p4700_p10, %p4694_p7 }
  0x69   :  { %4704 = shalt.err (!%p4701_p11)
}
  0x6a   :  { %s5822_s25 = smov 64   ;;  %s5823_s0 = sld [smem:[#allocation26_spill]] }
  0x6b   :  { %42 = dma.hbm_to_vmem [thread:$0]  %s5821_s2, 128, %s37_s24, [#allocation3], %s5822_s25, %s5822_s25, %s4830_s21  }
  0x70   :  { %s4705_s1 = scalar_lea.hbm %s5823_s0, 1024 }
  0x71   :  { %p4706_p12 = scmp.ne.s32.totalorder %s5823_s0, %s4705_s1  ;;  %p4709_p13 = scmp.lt.u32.totalorder %s4705_s1, %s5823_s0 }
  0x73   :  { %p4711_p0 = pnand %p4709_p13, %p4706_p12 }
  0x75   :  { %4714 = shalt.err (!%p4711_p0)
}
  0x76   :  { %s4715_s4 = scalar_lea.vmem %s5027_s3, 1024  ;;  %p4720_p2 = scmp.lt.s32.totalorder %s5027_s3, %s5027_s3 }
  0x77   :  { %p4716_p1 = scmp.ne.s32.totalorder %s5027_s3, %s4715_s4  ;;  %p4721_p3 = scmp.lt.s32.totalorder %s4715_s4, %s4715_s4 }
  0x79   :  { %p4722_p4 = por %p4721_p3, %p4720_p2 }
  0x7b   :  { %p4723_p5 = pnand %p4722_p4, %p4716_p1 }
  0x7d   :  { %4726 = shalt.err (!%p4723_p5)
}
  0x7e   :  { %66 = dma.hbm_to_vmem [thread:$0]  %s5823_s0, 1024, %s5027_s3, [#allocation6], %s5822_s25, %s5822_s25, %s4830_s21  }
  0x7f   :  { %s4837_s16 = smov [#allocation10]   ;;  %s4838_s30 = smov [#allocation13]  }
  0x80   :  { %s92_s29 = sshll.u32 %s4837_s16, 4  ;;  %s120_s6 = sshll.u32 %s4838_s30, 4  ;;  %s93_s29 = int_to_ptr.vmem [resolvable:$true] %s92_s29  ;;  %s5064_s6 = int_to_ptr.vmem [resolvable:$true] %s120_s6 }
  0x81   :  { %s4727_s20 = scalar_lea.hbm %s5795_s8, 1024 }
  0x82   :  { %p4728_p6 = scmp.ne.s32.totalorder %s5795_s8, %s4727_s20  ;;  %p4731_p7 = scmp.lt.u32.totalorder %s4727_s20, %s5795_s8 }
  0x84   :  { %p4733_p8 = pnand %p4731_p7, %p4728_p6 }
  0x86   :  { %4736 = shalt.err (!%p4733_p8)
}
  0x87   :  { %s4737_s3 = scalar_lea.vmem %s93_s29, 1024  ;;  %p4742_p10 = scmp.lt.s32.totalorder %s93_s29, %s93_s29 }
  0x88   :  { %p4738_p9 = scmp.ne.s32.totalorder %s93_s29, %s4737_s3  ;;  %p4743_p11 = scmp.lt.s32.totalorder %s4737_s3, %s4737_s3 }
  0x8a   :  { %p4744_p12 = por %p4743_p11, %p4742_p10 }
  0x8c   :  { %p4745_p13 = pnand %p4744_p12, %p4738_p9 }
  0x8e   :  { %4748 = shalt.err (!%p4745_p13)
}
  0x8f   :  { %98 = dma.hbm_to_vmem [thread:$0]  %s5795_s8, 1024, %s93_s29, [#allocation9], %s5822_s25, %s5822_s25, %s4830_s21  }
  0x90   :  { %s4749_s30 = scalar_lea.hbm %s5799_s12, 1024 }
  0x91   :  { %p4750_p0 = scmp.ne.s32.totalorder %s5799_s12, %s4749_s30  ;;  %p4753_p1 = scmp.lt.u32.totalorder %s4749_s30, %s5799_s12 }
  0x93   :  { %p4755_p2 = pnand %p4753_p1, %p4750_p0 }
  0x95   :  { %4758 = shalt.err (!%p4755_p2)
}
  0x96   :  { %s4759_s27 = scalar_lea.vmem %s5064_s6, 1024  ;;  %p4764_p4 = scmp.lt.s32.totalorder %s5064_s6, %s5064_s6 }
  0x97   :  { %p4760_p3 = scmp.ne.s32.totalorder %s5064_s6, %s4759_s27  ;;  %p4765_p5 = scmp.lt.s32.totalorder %s4759_s27, %s4759_s27 }
  0x99   :  { %p4766_p6 = por %p4765_p5, %p4764_p4 }
  0x9b   :  { %p4767_p7 = pnand %p4766_p6, %p4760_p3 }
  0x9d   :  { %4770 = shalt.err (!%p4767_p7)
}
  0x9e   :  { %126 = dma.hbm_to_vmem [thread:$0]  %s5799_s12, 1024, %s5064_s6, [#allocation12], %s5822_s25, %s5822_s25, %s4830_s21  }
  0x9f   :  { %s4839_s28 = smov [#allocation16]   ;;  %s4771_s24 = scalar_lea.hbm %s5805_s18, 2048 }
  0xa0   :  { %s152_s4 = sshll.u32 %s4839_s28, 4  ;;  %p4772_p8 = scmp.ne.s32.totalorder %s5805_s18, %s4771_s24  ;;  %s153_s4 = int_to_ptr.vmem [resolvable:$true] %s152_s4 }
  0xa1   :  { %p4775_p9 = scmp.lt.u32.totalorder %s4771_s24, %s5805_s18 }
  0xa3   :  { %p4777_p10 = pnand %p4775_p9, %p4772_p8 }
  0xa5   :  { %4780 = shalt.err (!%p4777_p10)
}
  0xa6   :  { %s4781_s1 = scalar_lea.vmem %s153_s4, 2048  ;;  %p4786_p12 = scmp.lt.s32.totalorder %s153_s4, %s153_s4 }
  0xa7   :  { %p4782_p11 = scmp.ne.s32.totalorder %s153_s4, %s4781_s1  ;;  %p4787_p13 = scmp.lt.s32.totalorder %s4781_s1, %s4781_s1 }
  0xa9   :  { %p4788_p0 = por %p4787_p13, %p4786_p12 }
  0xab   :  { %p4789_p1 = pnand %p4788_p0, %p4782_p11 }
  0xad   :  { %4792 = shalt.err (!%p4789_p1)
}
  0xae   :  { %158 = dma.hbm_to_vmem [thread:$0]  %s5805_s18, 2048, %s153_s4, [#allocation15], %s5822_s25, %s5822_s25, %s4830_s21  }
  0xaf   :  { %4815 = dma.done.wait [#allocation3], 128  }
  0xb0   :  { %4816 = vsyncadd [#allocation3], 4294967168 }
  0xb1   :  { %4817 = dma.done.wait [#allocation6], 1280  }
  0xb2   :  { %4818 = vsyncadd [#allocation6], 4294966016 }
  0xb3   :  { %4819 = dma.done.wait [#allocation9], 2048  }
  0xb4   :  { %4820 = vsyncadd [#allocation9], 4294965248 }
  0xb5   :  { %4821 = dma.done.wait [#allocation12], 2048  }
  0xb6   :  { %4822 = vsyncadd [#allocation12], 4294965248 }
  0xb7   :  { %4823 = dma.done.wait [#allocation15], 4096  }
  0xb8   :  { %4824 = vsyncadd [#allocation15], 4294963200  ;;  %v4840_v0 = vmov 0.0   ;;  %vm4841_vm0 = vmmov 0   ;;  %v4456_v1 = vld [vmem:[#allocation7] sm:$0xff]   ;;  %v4457_v2 = vld [vmem:[#allocation7 + $0x8] sm:$0xff]  }
  0xb9   :  { %4204 = vmatprep.subr.bf16.mxu0 %v4840_v0  ;;  %4220 = vmatprep.mubr.msk.bf16.mxu0 %vm4841_vm0, %v4840_v0  ;;  %v4458_v3 = vld [vmem:[#allocation7 + $0x10] sm:$0xff]   ;;  %v4459_v4 = vld [vmem:[#allocation7 + $0x18] sm:$0xff]   ;;  %v4460_v6 = vld [vmem:[#allocation7 + $0x20] sm:$0xff]   ;;  %s5824_s20 = sld [smem:[#allocation27_spill]]  ;;  %s5825_s8 = sld [smem:[#allocation28_spill]]  ;;  %vm1577_vm1 = vcmask 261120  }
  0xba   :  { %4224 = vmatprep.subr.bf16.mxu1 %v4456_v1  ;;  %4205 = vmatpush3.bf16.msra.mxu0 %v4456_v1  ;;  %v4464_v5 = vld [vmem:[#allocation5] sm:$0xff]   ;;  %v4461_v7 = vld [vmem:[#allocation7 + $0x28] sm:$0xff]   ;;  %v4463_v9 = vld [vmem:[#allocation7 + $0x38] sm:$0xff]   ;;  %s4842_s3 = smov 96   ;;  %vm1762_vm2 = vcmask 130048   ;;  %vm2132_vm3 = vcmask 523264  }
  0xbb   :  { %4225 = vmatpush3.bf16.msra.mxu1 %v4456_v1  ;;  %4206 = vmatprep.subr.bf16.mxu0 %v4840_v0  ;;  %v4462_v8 = vld [vmem:[#allocation7 + $0x30] sm:$0xff]   ;;  %v4466_v10 = vld [vmem:[#allocation2] sm:$0xff]   ;;  %v4465_v11 = vld [vmem:[#allocation5 + $0x8] sm:$0xff]   ;;  %vm2134_vm4 = vcmask 785408   ;;  %s4847_s12 = smov [#allocation17]  }
  0xbc   :  { %4226 = vmatprep.subr.bf16.mxu1 %v4457_v2  ;;  %4240 = vmatprep.mubr.bf16.mxu1 %v4464_v5  ;;  %v4467_v33 = vld [vmem:[#allocation10] sm:$0xff]   ;;  %v4468_v34 = vld [vmem:[#allocation10 + $0x8] sm:$0xff]   ;;  %v4470_v36 = vld [vmem:[#allocation10 + $0x10] sm:$0xff]   ;;  %s3952_s6 = sshll.u32 %s4847_s12, 4  ;;  %s3953_s6 = int_to_ptr.vmem [resolvable:$true] %s3952_s6 }
  0xbd   :  { %v4469_v35 = vld [vmem:[#allocation8] sm:$0xff]   ;;  %v4471_v37 = vld [vmem:[#allocation8 + $0x8] sm:$0xff]   ;;  %v4472_v38 = vld [vmem:[#allocation10 + $0x18] sm:$0xff]   ;;  %s4793_s18 = scalar_lea.vmem %s3953_s6, 256  ;;  %p4798_p3 = scmp.lt.s32.totalorder %s3953_s6, %s3953_s6 }
  0xbe   :  { %4207 = vmatpush3.bf16.msra.mxu0 %v4457_v2  ;;  %v4473_v39 = vld [vmem:[#allocation8 + $0x10] sm:$0xff]   ;;  %v4474_v40 = vld [vmem:[#allocation10 + $0x20] sm:$0xff]   ;;  %v4475_v41 = vld [vmem:[#allocation8 + $0x18] sm:$0xff]   ;;  %p4794_p2 = scmp.ne.s32.totalorder %s3953_s6, %s4793_s18  ;;  %p4799_p4 = scmp.lt.s32.totalorder %s4793_s18, %s4793_s18 }
  0xbf   :  { %4227 = vmatpush3.bf16.msra.mxu1 %v4457_v2  ;;  %4208 = vmatprep.subr.bf16.mxu0 %v4840_v0  ;;  %v3968_v12 = vld [vmem:[%s5824_s20] ss:$0 sm:$0xff]  ;;  %v4477_v43 = vld [vmem:[#allocation8 + $0x20] sm:$0xff]   ;;  %v4478_v44 = vld [vmem:[#allocation10 + $0x30] sm:$0xff]  }
  0xc0   :  { %4228 = vmatprep.subr.bf16.mxu1 %v4458_v3  ;;  %v4476_v42 = vld [vmem:[#allocation10 + $0x28] sm:$0xff]   ;;  %v4480_v45 = vld [vmem:[#allocation10 + $0x38] sm:$0xff]   ;;  %v4481_v47 = vld [vmem:[#allocation8 + $0x30] sm:$0xff]   ;;  %p4800_p5 = por %p4799_p4, %p4798_p3 }
  0xc1   :  { %v4479_v46 = vld [vmem:[#allocation8 + $0x28] sm:$0xff]   ;;  %v4482_v48 = vld [vmem:[#allocation8 + $0x38] sm:$0xff]   ;;  %v5170_v49 = vld [vmem:[#allocation11] sm:$0xff]  }
  0xc2   :  { %4209 = vmatpush3.bf16.msra.mxu0 %v4458_v3  ;;  %p4801_p6 = pnand %p4800_p5, %p4794_p2 }
  0xc3   :  { %4229 = vmatpush3.bf16.msra.mxu1 %v4458_v3  ;;  %4210 = vmatprep.subr.bf16.mxu0 %v4840_v0 }
  0xc4   :  { %4230 = vmatprep.subr.bf16.mxu1 %v4459_v4 }
  0xc6   :  { %4211 = vmatpush3.bf16.msra.mxu0 %v4459_v4 }
  0xc7   :  { %4231 = vmatpush3.bf16.msra.mxu1 %v4459_v4  ;;  %4212 = vmatprep.subr.bf16.mxu0 %v4840_v0 }
  0xc8   :  { %4232 = vmatprep.subr.bf16.mxu1 %v4460_v6 }
  0xca   :  { %4213 = vmatpush3.bf16.msra.mxu0 %v4460_v6 }
  0xcb   :  { %4233 = vmatpush3.bf16.msra.mxu1 %v4460_v6  ;;  %4214 = vmatprep.subr.bf16.mxu0 %v4840_v0 }
  0xcc   :  { %4234 = vmatprep.subr.bf16.mxu1 %v4461_v7 }
  0xce   :  { %4215 = vmatpush3.bf16.msra.mxu0 %v4461_v7 }
  0xcf   :  { %4235 = vmatpush3.bf16.msra.mxu1 %v4461_v7  ;;  %4216 = vmatprep.subr.bf16.mxu0 %v4840_v0 }
  0xd0   :  { %4236 = vmatprep.subr.bf16.mxu1 %v4462_v8 }
  0xd2   :  { %4217 = vmatpush3.bf16.msra.mxu0 %v4462_v8 }
  0xd3   :  { %4237 = vmatpush3.bf16.msra.mxu1 %v4462_v8  ;;  %4218 = vmatprep.subr.bf16.mxu0 %v4840_v0 }
  0xd4   :  { %4238 = vmatprep.subr.bf16.mxu1 %v4463_v9 }
  0xd6   :  { %4219 = vmatpush3.bf16.msra.mxu0 %v4463_v9 }
  0xd7   :  { %4239 = vmatpush3.bf16.msra.mxu1 %v4463_v9  ;;  %4244 = vmatprep.subr.bf16.mxu0 %v4840_v0 }
  0xd8   :  { %4264 = vmatprep.subr.bf16.mxu1 %v4467_v33 }
  0xd9   :  { %4221 = vmatmul.mubr.bf16.vlgmr.msra.gmra.mrb[0].mxu0 %v4466_v10 }
  0xda   :  { %4241 = vmatmul.mubr.bf16.vlgmr.msra.gmra.mrb[0].mxu1 %v4465_v11  ;;  %4260 = vmatprep.mubr.msk.bf16.mxu0 %vm4841_vm0, %v4840_v0 }
  0xdb   :  { %4265 = vmatpush3.bf16.msra.mxu1 %v4467_v33  ;;  %4245 = vmatpush3.bf16.msra.mxu0 %v4469_v35 }
  0xdc   :  { %4266 = vmatprep.subr.bf16.mxu1 %v4468_v34  ;;  %4246 = vmatprep.subr.bf16.mxu0 %v4840_v0 }
  0xdf   :  { %4267 = vmatpush3.bf16.msra.mxu1 %v4468_v34  ;;  %4247 = vmatpush3.bf16.msra.mxu0 %v4471_v37  ;;  %v3980_v37 = vld [vmem:[%s5825_s8] ss:$0 sm:$0xff] }
  0xe0   :  { %4268 = vmatprep.subr.bf16.mxu1 %v4470_v36  ;;  %4248 = vmatprep.subr.bf16.mxu0 %v4840_v0 }
  0xe3   :  { %4269 = vmatpush3.bf16.msra.mxu1 %v4470_v36  ;;  %4249 = vmatpush3.bf16.msra.mxu0 %v4473_v39 }
  0xe4   :  { %4270 = vmatprep.subr.bf16.mxu1 %v4472_v38  ;;  %4250 = vmatprep.subr.bf16.mxu0 %v4840_v0 }
  0xe7   :  { %4271 = vmatpush3.bf16.msra.mxu1 %v4472_v38  ;;  %4251 = vmatpush3.bf16.msra.mxu0 %v4475_v41  ;;  %v3981_v41 = vld [vmem:[%s5792_s5] ss:$0 sm:$0xff] }
  0xe8   :  { %4272 = vmatprep.subr.bf16.mxu1 %v4474_v40  ;;  %4252 = vmatprep.subr.bf16.mxu0 %v4840_v0 }
  0xeb   :  { %4273 = vmatpush3.bf16.msra.mxu1 %v4474_v40  ;;  %4253 = vmatpush3.bf16.msra.mxu0 %v4477_v43 }
  0xec   :  { %4274 = vmatprep.subr.bf16.mxu1 %v4476_v42  ;;  %4254 = vmatprep.subr.bf16.mxu0 %v4840_v0 }
  0xef   :  { %4275 = vmatpush3.bf16.msra.mxu1 %v4476_v42  ;;  %4255 = vmatpush3.bf16.msra.mxu0 %v4479_v46 }
  0xf0   :  { %4276 = vmatprep.subr.bf16.mxu1 %v4478_v44  ;;  %4256 = vmatprep.subr.bf16.mxu0 %v4840_v0 }
  0xf3   :  { %4277 = vmatpush3.bf16.msra.mxu1 %v4478_v44  ;;  %4257 = vmatpush3.bf16.msra.mxu0 %v4481_v47 }
  0xf4   :  { %4278 = vmatprep.subr.bf16.mxu1 %v4480_v45  ;;  %4258 = vmatprep.subr.bf16.mxu0 %v4840_v0 }
  0xf7   :  { %4279 = vmatpush3.bf16.msra.mxu1 %v4480_v45  ;;  %4259 = vmatpush3.bf16.msra.mxu0 %v4482_v48 }
  0xf8   :  { %4304 = vmatprep.subr.bf16.mxu1 %v4840_v0  ;;  %4284 = vmatprep.subr.bf16.mxu0 %v5170_v49 }
 0x1ac   :  { %v306_v13 = vpop.f32.mrb[0].mxu0 }
 0x1ad   :  { %v4242_v14 = vpop.f32.mrb[0].mxu1  ;;  %v4222_v15 = vpop.f32.mrb[1].mxu0  ;;  %v5154_v30 = vadd.f32 %v3968_v12, %v306_v13 }
 0x1ae   :  { %v5132_v16 = vadd.f32 %v4242_v14, %v3968_v12  ;;  %v359_v17 = vpop.f32.mrb[1].mxu1  ;;  %v309_v18 = vpop.f32.mrb[2].mxu0 }
 0x1af   :  { %v5134_v19 = vadd.f32 %v3968_v12, %v359_v17  ;;  %v4243_v20 = vpop.f32.mrb[2].mxu1  ;;  %v4223_v21 = vpop.f32.mrb[3].mxu0  ;;  %v5152_v29 = vadd.f32 %v3968_v12, %v309_v18  ;;  %v383_v32 = vmul.f32 %v5154_v30, %v5154_v30 }
 0x1b0   :  { %423 = vadd.xlane.f32.xlu1 %v5132_v16  ;;  %v362_v22 = vpop.f32.mrb[3].mxu1  ;;  %v5138_v23 = vadd.f32 %v4243_v20, %v3968_v12  ;;  %v433_v28 = vmul.f32 %v5132_v16, %v5132_v16 }
 0x1b1   :  { %419 = vadd.xlane.f32.xlu0 %v5134_v19  ;;  %v5140_v24 = vadd.f32 %v3968_v12, %v362_v22  ;;  %v431_v26 = vmul.f32 %v5134_v19, %v5134_v19  ;;  %v384_v31 = vmul.f32 %v5152_v29, %v5152_v29 }
 0x1b2   :  { %v434_v27 = vmul.f32 %v5138_v23, %v5138_v23 }
 0x1b3   :  { %v432_v25 = vmul.f32 %v5140_v24, %v5140_v24 }
 0x1b4   :  { %425 = vadd.xlane.f32.xlu1 %v5138_v23 }
 0x1b5   :  { %421 = vadd.xlane.f32.xlu0 %v5140_v24 }
 0x1b8   :  { %437 = vadd.xlane.f32.xlu1 %v432_v25 }
 0x1b9   :  { %435 = vadd.xlane.f32.xlu0 %v431_v26 }
 0x1bc   :  { %441 = vadd.xlane.f32.xlu1 %v434_v27 }
 0x1bd   :  { %439 = vadd.xlane.f32.xlu0 %v433_v28 }
 0x1c0   :  { %378 = vadd.xlane.f32.xlu1 %v5152_v29 }
 0x1c1   :  { %376 = vadd.xlane.f32.xlu0 %v5154_v30 }
 0x1c4   :  { %387 = vadd.xlane.f32.xlu1 %v384_v31 }
 0x1c5   :  { %385 = vadd.xlane.f32.xlu0 %v383_v32 }
 0x23d   :  { %v424_v50 = vpop.xlane.xlu1 %423 }
 0x23e   :  { %v420_v51 = vpop.xlane.xlu0 %419  ;;  %v429_v61 = vmul.f32 0.0078125, %v424_v50 }
 0x23f   :  { %v427_v54 = vmul.f32 0.0078125, %v420_v51 }
 0x240   :  { %v449_v8 = vmul.f32 %v429_v61, %v429_v61 }
 0x241   :  { %v426_v52 = vpop.xlane.xlu1 %425  ;;  %v447_v62 = vmul.f32 %v427_v54, %v427_v54  ;;  %v455_v35 = vsub.f32 %v5134_v19, %v427_v54  ;;  %v457_v19 = vsub.f32 %v5132_v16, %v429_v61 }
 0x242   :  { %v422_v53 = vpop.xlane.xlu0 %421  ;;  %v430_v58 = vmul.f32 0.0078125, %v426_v52 }
 0x243   :  { %v428_v55 = vmul.f32 0.0078125, %v422_v53 }
 0x244   :  { %v450_v4 = vmul.f32 %v430_v58, %v430_v58 }
 0x245   :  { %v448_v56 = vmul.f32 %v428_v55, %v428_v55  ;;  %v438_v57 = vpop.xlane.xlu1 %437  ;;  %v456_v32 = vsub.f32 %v5140_v24, %v428_v55  ;;  %v458_v24 = vsub.f32 %v5138_v23, %v430_v58 }
 0x246   :  { %v444_v59 = vmul.f32 0.0078125, %v438_v57  ;;  %v436_v60 = vpop.xlane.xlu0 %435 }
 0x247   :  { %v443_v63 = vmul.f32 0.0078125, %v436_v60 }
 0x248   :  { %v452_v1 = vsub.f32 %v444_v59, %v448_v56 }
 0x249   :  { %v451_v2 = vsub.f32 %v443_v63, %v447_v62  ;;  %v442_v3 = vpop.xlane.xlu1 %441 }
 0x24a   :  { %v460_v5 = vadd.f32 1e-05, %v452_v1  ;;  %v446_v6 = vmul.f32 0.0078125, %v442_v3  ;;  %v440_v7 = vpop.xlane.xlu0 %439  ;;  %v4484_v3 = vld [vmem:[#allocation11 + $0x8] sm:$0xff]  }
 0x24b   :  { %v459_v9 = vadd.f32 1e-05, %v451_v2  ;;  %v445_v10 = vmul.f32 0.0078125, %v440_v7  ;;  %v4489_v7 = vld [vmem:[#allocation11 + $0x30] sm:$0xff]  }
 0x24c   :  { %4539 = vrsqrt.f32 %v460_v5  ;;  %v454_v11 = vsub.f32 %v446_v6, %v450_v4  ;;  %v4486_v4 = vld [vmem:[#allocation11 + $0x18] sm:$0xff]   ;;  %v4487_v5 = vld [vmem:[#allocation11 + $0x20] sm:$0xff]   ;;  %v4488_v6 = vld [vmem:[#allocation11 + $0x28] sm:$0xff]  }
 0x24d   :  { %4541 = vrsqrt.f32 %v459_v9  ;;  %v453_v12 = vsub.f32 %v445_v10, %v449_v8  ;;  %v379_v13 = vpop.xlane.xlu1 %378  ;;  %v4490_v8 = vld [vmem:[#allocation11 + $0x38] sm:$0xff]  }
 0x24e   :  { %v462_v14 = vadd.f32 1e-05, %v454_v11  ;;  %v382_v15 = vmul.f32 0.0078125, %v379_v13  ;;  %v377_v17 = vpop.xlane.xlu0 %376 }
 0x24f   :  { %v461_v18 = vadd.f32 1e-05, %v453_v12  ;;  %v381_v20 = vmul.f32 0.0078125, %v377_v17 }
 0x250   :  { %4543 = vrsqrt.f32 %v462_v14  ;;  %v392_v21 = vmul.f32 %v382_v15, %v382_v15  ;;  %v396_v57 = vsub.f32 %v5152_v29, %v382_v15 }
 0x251   :  { %4545 = vrsqrt.f32 %v461_v18  ;;  %v391_v22 = vmul.f32 %v381_v20, %v381_v20  ;;  %v388_v25 = vpop.xlane.xlu1 %387  ;;  %v395_v58 = vsub.f32 %v5154_v30, %v381_v20  ;;  %v4485_v30 = vld [vmem:[#allocation11 + $0x10] sm:$0xff]   ;;  %v3982_v18 = vld [vmem:[%s5794_s7] ss:$0 sm:$0xff] }
 0x252   :  { %v390_v26 = vmul.f32 0.0078125, %v388_v25  ;;  %v386_v27 = vpop.xlane.xlu0 %385 }
 0x253   :  { %v389_v28 = vmul.f32 0.0078125, %v386_v27 }
 0x254   :  { %v394_v31 = vsub.f32 %v390_v26, %v392_v21 }
 0x255   :  { %v393_v33 = vsub.f32 %v389_v28, %v391_v22 }
 0x256   :  { %v4540_v34 = vpop.eup %4539  ;;  %v398_v36 = vadd.f32 1e-05, %v394_v31  ;;  %v5231_v31 = vld [vmem:[%s5798_s11] ss:$0 sm:$0xff] }
 0x257   :  { %v4542_v38 = vpop.eup %4541  ;;  %v397_v39 = vadd.f32 1e-05, %v393_v33  ;;  %v468_v40 = vmul.f32 %v4540_v34, %v456_v32 }
 0x258   :  { %4547 = vrsqrt.f32 %v398_v36  ;;  %v467_v42 = vmul.f32 %v4542_v38, %v455_v35  ;;  %v4844_v38 = vmov 1983009808  }
 0x259   :  { %4549 = vrsqrt.f32 %v397_v39  ;;  %v472_v43 = vmul.f32 %v3980_v37, %v468_v40  ;;  %v848_v39 = vunpack.c.l.s4 %v4844_v38  ;;  %v850_v40 = vlaneseq }
 0x25a   :  { %v4544_v44 = vpop.eup %4543  ;;  %v471_v45 = vmul.f32 %v3980_v37, %v467_v42 }
 0x25b   :  { %v4546_v46 = vpop.eup %4545  ;;  %v476_v47 = vadd.f32 %v3981_v41, %v472_v43  ;;  %v470_v48 = vmul.f32 %v4544_v44, %v458_v24  ;;  %v849_v24 = vunpack.c.0.s8 %v848_v39  ;;  %v5243_v43 = vshrl.u32 %v850_v40, 7 }
 0x25c   :  { %v475_v50 = vadd.f32 %v3981_v41, %v471_v45  ;;  %v469_v51 = vmul.f32 %v4546_v46, %v457_v19 }
 0x25d   :  { %v474_v52 = vmul.f32 %v3980_v37, %v470_v48  ;;  %v5246_v46 = vsub.s32 %v849_v24, %v5243_v43 }
 0x25e   :  { %v480_v53 = vpack.c.bf16 %v476_v47, %v475_v50  ;;  %v473_v54 = vmul.f32 %v3980_v37, %v469_v51 }
 0x25f   :  { %v478_v55 = vadd.f32 %v3981_v41, %v474_v52 }
 0x260   :  { %4280 = vmatprep.mubr.bf16.mxu1 %v480_v53  ;;  %v477_v56 = vadd.f32 %v3981_v41, %v473_v54 }
 0x262   :  { %v4548_v23 = vpop.eup %4547  ;;  %v481_v59 = vpack.c.bf16 %v478_v55, %v477_v56 }
 0x263   :  { %v4550_v60 = vpop.eup %4549  ;;  %v402_v16 = vmul.f32 %v4548_v23, %v396_v57 }
 0x264   :  { %4281 = vmatmul.mubr.bf16.vlgmr.msra.gmra.mrb[4].mxu1 %v481_v59  ;;  %v401_v61 = vmul.f32 %v4550_v60, %v395_v58 }
 0x265   :  { %v410_v62 = vmul.f32 %v3980_v37, %v402_v16  ;;  %4306 = vmatprep.mubr.msk.bf16.mxu1 %vm4841_vm0, %v4840_v0 }
 0x266   :  { %v409_v63 = vmul.f32 %v3980_v37, %v401_v61 }
 0x267   :  { %v5187_v1 = vadd.f32 %v3981_v41, %v410_v62 }
 0x268   :  { %v5189_v2 = vadd.f32 %v3981_v41, %v409_v63  ;;  %v4845_v41 = vmov 1934713408  }
 0x269   :  { %v880_v42 = vunpack.c.l.s4 %v4845_v41 }
 0x26a   :  { %v479_v29 = vpack.c.bf16 %v5187_v1, %v5189_v2 }
 0x26b   :  { %v881_v45 = vunpack.c.0.s8 %v880_v42 }
 0x26c   :  { %4261 = vmatmul.mubr.bf16.vlgmr.msra.gmra.mrb[4].mxu0 %v479_v29 }
 0x26d   :  { %4285 = vmatpush3.bf16.msra.mxu0 %v5170_v49  ;;  %4300 = vmatprep.mubr.bf16.mxu0 %v480_v53  ;;  %v3991_v49 = vld [vmem:[%s5796_s9] ss:$0 sm:$0xff]  ;;  %s4843_s9 = smov 32   ;;  %v5249_v54 = vsub.s32 %v881_v45, %v5243_v43 }
 0x26e   :  { %4286 = vmatprep.subr.bf16.mxu0 %v4484_v3 }
 0x271   :  { %4287 = vmatpush3.bf16.msra.mxu0 %v4484_v3 }
 0x272   :  { %4288 = vmatprep.subr.bf16.mxu0 %v4485_v30 }
 0x275   :  { %4289 = vmatpush3.bf16.msra.mxu0 %v4485_v30 }
 0x276   :  { %4290 = vmatprep.subr.bf16.mxu0 %v4486_v4 }
 0x279   :  { %4291 = vmatpush3.bf16.msra.mxu0 %v4486_v4 }
 0x27a   :  { %4292 = vmatprep.subr.bf16.mxu0 %v4487_v5 }
 0x27d   :  { %4293 = vmatpush3.bf16.msra.mxu0 %v4487_v5 }
 0x27e   :  { %4294 = vmatprep.subr.bf16.mxu0 %v4488_v6 }
 0x281   :  { %4295 = vmatpush3.bf16.msra.mxu0 %v4488_v6 }
 0x282   :  { %4296 = vmatprep.subr.bf16.mxu0 %v4489_v7 }
 0x285   :  { %4297 = vmatpush3.bf16.msra.mxu0 %v4489_v7 }
 0x286   :  { %4298 = vmatprep.subr.bf16.mxu0 %v4490_v8 }
 0x289   :  { %4299 = vmatpush3.bf16.msra.mxu0 %v4490_v8 }
 0x28a   :  { %4352 = vmatprep.subr.bf16.mxu0 %v4840_v0 }
 0x28c   :  { %4301 = vmatmul.mubr.bf16.vlgmr.msra.gmra.mrb[8].mxu0 %v481_v59 }
 0x28d   :  { %4354 = vmatprep.mubr.msk.bf16.mxu0 %vm4841_vm0, %v4840_v0 }
 0x337   :  { %v4282_v9 = vpop.f32.mrb[4].mxu1 }
 0x338   :  { %v5200_v10 = vadd.f32 %v4282_v9, %v3991_v49  ;;  %v699_v11 = vpop.f32.mrb[5].mxu1 }
 0x339   :  { %v700_v12 = vadd.f32 %v3991_v49, %v699_v11  ;;  %v4283_v13 = vpop.f32.mrb[6].mxu1 }
 0x33a   :  { %v5202_v14 = vadd.f32 %v4283_v13, %v3991_v49  ;;  %v702_v15 = vpop.f32.mrb[7].mxu1 }
 0x33b   :  { %987 = vrot.lane.b32.xlu0 %v700_v12, %s4842_s3  ;;  %993 = vrot.lane.b32.xlu1 %v700_v12, %s5822_s25  ;;  %v5206_v17 = vadd.f32 %v3991_v49, %v702_v15 }
 0x33f   :  { %999 = vrot.lane.b32.xlu0 %v700_v12, %s4843_s9  ;;  %989 = vrot.lane.b32.xlu1 %v5206_v17, %s4842_s3  ;;  %v587_v20 = vpop.f32.mrb[4].mxu0 }
 0x340   :  { %v588_v21 = vadd.f32 %v3982_v18, %v587_v20  ;;  %v4262_v22 = vpop.f32.mrb[5].mxu0 }
 0x341   :  { %v590_v25 = vpop.f32.mrb[6].mxu0 }
 0x342   :  { %v5214_v26 = vmul.f32 0.17677669, %v588_v21  ;;  %v5216_v27 = vadd.f32 %v3982_v18, %v590_v25  ;;  %v4263_v28 = vpop.f32.mrb[7].mxu0 }
 0x343   :  { %995 = vrot.lane.b32.xlu1 %v5206_v17, %s5822_s25 }
 0x344   :  { %836 = vrot.lane.b32.xlu0 %v5214_v26, %s4842_s3 }
 0x347   :  { %1001 = vrot.lane.b32.xlu1 %v5206_v17, %s4843_s9 }
 0x348   :  { %842 = vrot.lane.b32.xlu0 %v5214_v26, %s4843_s9 }
 0x34b   :  { %839 = vrot.lane.b32.xlu1 %v5214_v26, %s5822_s25 }
 0x35f   :  { %v4302_v32 = vpop.f32.mrb[8].mxu0 }
 0x360   :  { %v5234_v33 = vadd.f32 %v4302_v32, %v5231_v31  ;;  %v5236_v34 = vpop.f32.mrb[9].mxu0 }
 0x361   :  { %v4303_v35 = vpop.f32.mrb[10].mxu0 }
 0x362   :  { %v5239_v36 = vadd.f32 %v4303_v35, %v5231_v31  ;;  %v5241_v37 = vpop.f32.mrb[11].mxu0 }
 0x3ad   :  { %v988_v44 = vpop.permute.xlu0 %987  ;;  %v994_v19 = vpop.permute.xlu1 %993 }
 0x3ae   :  { %v1005_v47 = vcombine.low %v700_v12, %v994_v19  ;;  %v1006_v48 = vcombine.high %v700_v12, %v994_v19 }
 0x3b0   :  { %v1013_v55 = vrot.slane %v1005_v47, %v5246_v46  ;;  %v1020_v56 = vrot.slane %v1006_v48, %v5246_v46 }
 0x3b1   :  { %v1000_v50 = vpop.permute.xlu0 %999  ;;  %v990_v51 = vpop.permute.xlu1 %989 }
 0x3b2   :  { %v1021_v52 = vcombine.low %v988_v44, %v1000_v50  ;;  %v1022_v53 = vcombine.high %v988_v44, %v1000_v50 }
 0x3b4   :  { %v1029_v57 = vrot.slane %v1021_v52, %v5246_v46  ;;  %v1036_v23 = vrot.slane %v1022_v53, %v5246_v46 }
 0x3b5   :  { %v996_v58 = vpop.permute.xlu1 %995 }
 0x3b6   :  { %v1037_v59 = vcombine.low %v1013_v55, %v1029_v57  ;;  %v1038_v60 = vcombine.high %v1013_v55, %v1029_v57  ;;  %v1053_v16 = vcombine.low %v1020_v56, %v1036_v23  ;;  %v1054_v61 = vcombine.high %v1020_v56, %v1036_v23  ;;  %v837_v62 = vpop.permute.xlu0 %836 }
 0x3b7   :  { %v1073_v4 = vcombine.low %v5206_v17, %v996_v58  ;;  %v1074_v5 = vcombine.high %v5206_v17, %v996_v58 }
 0x3b8   :  { %v1045_v63 = vrot.slane %v1037_v59, %v5249_v54  ;;  %v1052_v29 = vrot.slane %v1038_v60, %v5249_v54  ;;  %v1061_v3 = vrot.slane %v1053_v16, %v5249_v54  ;;  %v1068_v30 = vrot.slane %v1054_v61, %v5249_v54 }
 0x3b9   :  { %v1002_v6 = vpop.permute.xlu1 %1001  ;;  %v1081_v25 = vrot.slane %v1073_v4, %v5246_v46  ;;  %v1088_v28 = vrot.slane %v1074_v5, %v5246_v46 }
 0x3ba   :  { %v1141_v7 = vcombine.low %v1045_v63, %v1052_v29  ;;  %v4011_v8 = vcombine.high %v1045_v63, %v1052_v29  ;;  %v1157_v49 = vcombine.low %v1061_v3, %v1068_v30  ;;  %v4012_v9 = vcombine.high %v1061_v3, %v1068_v30  ;;  %v843_v11 = vpop.permute.xlu0 %842 }
 0x3bb   :  { %v1089_v12 = vcombine.low %v990_v51, %v1002_v6  ;;  %v1090_v13 = vcombine.high %v990_v51, %v1002_v6  ;;  %v861_v15 = vcombine.low %v837_v62, %v843_v11  ;;  %v862_v18 = vcombine.high %v837_v62, %v843_v11 }
 0x3bc   :  { %v5262_v20 = vrot.slane %v1141_v7, %v5246_v46  ;;  %v5265_v21 = vrot.slane %v4011_v8, %v5246_v46  ;;  %v5268_v22 = vrot.slane %v1157_v49, %v5246_v46  ;;  %v5271_v17 = vrot.slane %v4012_v9, %v5246_v46 }
 0x3bd   :  { %v1097_v32 = vrot.slane %v1089_v12, %v5246_v46  ;;  %v1104_v35 = vrot.slane %v1090_v13, %v5246_v46  ;;  %v840_v38 = vpop.permute.xlu1 %839  ;;  %v869_v39 = vrot.slane %v861_v15, %v5246_v46  ;;  %v876_v40 = vrot.slane %v862_v18, %v5246_v46 }
 0x3be   :  { %v845_v41 = vcombine.low %v5214_v26, %v840_v38  ;;  %v846_v42 = vcombine.high %v5214_v26, %v840_v38  ;;  %v1173_v50 = vcombine.low %v5262_v20, %v5265_v21  ;;  %v1189_v51 = vcombine.low %v5268_v22, %v5271_v17 }
 0x3bf   :  { %v1105_v24 = vcombine.low %v1081_v25, %v1097_v32  ;;  %v1106_v44 = vcombine.high %v1081_v25, %v1097_v32  ;;  %v1121_v19 = vcombine.low %v1088_v28, %v1104_v35  ;;  %v1122_v45 = vcombine.high %v1088_v28, %v1104_v35 }
 0x3c0   :  { %v853_v47 = vrot.slane %v845_v41, %v5246_v46  ;;  %v860_v48 = vrot.slane %v846_v42, %v5246_v46  ;;  %v1181_v11 = vrot.slane %v1173_v50, %v5249_v54  ;;  %v1197_v12 = vrot.slane %v1189_v51, %v5249_v54 }
 0x3c1   :  { %v1113_v52 = vrot.slane %v1105_v24, %v5249_v54  ;;  %v1120_v53 = vrot.slane %v1106_v44, %v5249_v54  ;;  %v1129_v26 = vrot.slane %v1121_v19, %v5249_v54  ;;  %v1136_v55 = vrot.slane %v1122_v45, %v5249_v54 }
 0x3c2   :  { %v877_v56 = vcombine.low %v853_v47, %v869_v39  ;;  %v878_v57 = vcombine.high %v853_v47, %v869_v39  ;;  %v893_v23 = vcombine.low %v860_v48, %v876_v40  ;;  %v894_v58 = vcombine.high %v860_v48, %v876_v40 }
 0x3c3   :  { %v1209_v59 = vcombine.low %v1113_v52, %v1120_v53  ;;  %v4013_v60 = vcombine.high %v1113_v52, %v1120_v53  ;;  %v1225_v16 = vcombine.low %v1129_v26, %v1136_v55  ;;  %v4014_v61 = vcombine.high %v1129_v26, %v1136_v55 }
 0x3c4   :  { %v885_v62 = vrot.slane %v877_v56, %v5249_v54  ;;  %v892_v63 = vrot.slane %v878_v57, %v5249_v54  ;;  %v901_v29 = vrot.slane %v893_v23, %v5249_v54  ;;  %v908_v3 = vrot.slane %v894_v58, %v5249_v54 }
 0x3c5   :  { %v1216_v30 = vrot.slane %v1209_v59, %v5246_v46  ;;  %v1224_v4 = vrot.slane %v4013_v60, %v5246_v46  ;;  %v1232_v5 = vrot.slane %v1225_v16, %v5246_v46  ;;  %v1240_v6 = vrot.slane %v4014_v61, %v5246_v46 }
 0x3c6   :  { %v913_v7 = vcombine.low %v885_v62, %v892_v63  ;;  %v4009_v8 = vcombine.high %v885_v62, %v892_v63  ;;  %v929_v49 = vcombine.low %v901_v29, %v908_v3  ;;  %v4010_v9 = vcombine.high %v901_v29, %v908_v3 }
 0x3c7   :  { %v1241_v13 = vcombine.low %v1216_v30, %v1224_v4  ;;  %v1257_v15 = vcombine.low %v1232_v5, %v1240_v6  ;;  %v1205_v41 = vcombine.low %v1181_v11, %v1197_v12  ;;  %v1242_v48 = vcombine.high %v1216_v30, %v1224_v4 }
 0x3c8   :  { %v920_v18 = vrot.slane %v913_v7, %v5246_v46  ;;  %v928_v25 = vrot.slane %v4009_v8, %v5246_v46  ;;  %v936_v28 = vrot.slane %v929_v49, %v5246_v46  ;;  %v944_v32 = vrot.slane %v4010_v9, %v5246_v46 }
 0x3c9   :  { %v1249_v35 = vrot.slane %v1241_v13, %v5249_v54  ;;  %v1265_v38 = vrot.slane %v1257_v15, %v5249_v54  ;;  %v1258_v50 = vcombine.high %v1232_v5, %v1240_v6  ;;  %v1206_v52 = vcombine.high %v1181_v11, %v1197_v12 }
 0x3ca   :  { %v945_v39 = vcombine.low %v920_v18, %v928_v25  ;;  %v961_v40 = vcombine.low %v936_v28, %v944_v32  ;;  %v1174_v53 = vcombine.high %v5262_v20, %v5265_v21  ;;  %v1190_v26 = vcombine.high %v5268_v22, %v5271_v17 }
 0x3cb   :  { %v1273_v42 = vcombine.low %v1249_v35, %v1265_v38  ;;  %v1274_v47 = vcombine.high %v1249_v35, %v1265_v38  ;;  %v1256_v56 = vrot.slane %v1242_v48, %v5249_v54  ;;  %v1272_v57 = vrot.slane %v1258_v50, %v5249_v54 }
 0x3cc   :  { %v953_v44 = vrot.slane %v945_v39, %v5249_v54  ;;  %v969_v19 = vrot.slane %v961_v40, %v5249_v54  ;;  %v1188_v58 = vrot.slane %v1174_v53, %v5249_v54  ;;  %v1204_v59 = vrot.slane %v1190_v26, %v5249_v54 }
 0x3cd   :  { %v1277_v24 = vpack.c.bf16 %v1273_v42, %v1205_v41  ;;  %v1278_v55 = vpack.c.bf16 %v1274_v47, %v1206_v52  ;;  %v1275_v16 = vcombine.low %v1256_v56, %v1272_v57  ;;  %v946_v20 = vcombine.high %v920_v18, %v928_v25 }
 0x3ce   :  { %v977_v51 = vcombine.low %v953_v44, %v969_v19  ;;  %v962_v21 = vcombine.high %v936_v28, %v944_v32  ;;  %v978_v22 = vcombine.high %v953_v44, %v969_v19  ;;  %v1207_v17 = vcombine.low %v1188_v58, %v1204_v59 }
 0x3cf   :  { %v1582_v45 = vsel %vm1577_vm1, %v1277_v24, 0  ;;  %v1628_v60 = vsel %vm1577_vm1, %v1278_v55, 0  ;;  %v960_v63 = vrot.slane %v946_v20, %v5249_v54  ;;  %v1276_v30 = vcombine.high %v1256_v56, %v1272_v57 }
 0x3d0   :  { %4305 = vmatpush3.bf16.xpose.msra.mxu1 %v1582_v45  ;;  %v981_v23 = vpack.c.bf16 %v977_v51, %v977_v51  ;;  %v1279_v61 = vpack.c.bf16 %v1275_v16, %v1207_v17  ;;  %v982_v62 = vpack.c.bf16 %v978_v22, %v978_v22  ;;  %v976_v29 = vrot.slane %v962_v21, %v5249_v54 }
 0x3d1   :  { %4310 = vmatprep.subr.bf16.mxu1 %v4840_v0  ;;  %v1208_v5 = vcombine.high %v1188_v58, %v1204_v59  ;;  %v823_v40 = vadd.f32 %v5231_v31, %v5241_v37  ;;  %v5350_v19 = vadd.f32 %v5231_v31, %v5236_v34 }
 0x3d2   :  { %v1674_v3 = vsel %vm1577_vm1, %v1279_v61, 0  ;;  %v979_v4 = vcombine.low %v960_v63, %v976_v29  ;;  %v980_v49 = vcombine.high %v960_v63, %v976_v29 }
 0x3d3   :  { %v1280_v6 = vpack.c.bf16 %v1276_v30, %v1208_v5 }
 0x3d4   :  { %v983_v7 = vpack.c.bf16 %v979_v4, %v979_v4  ;;  %v984_v9 = vpack.c.bf16 %v980_v49, %v980_v49 }
 0x3d5   :  { %v1720_v8 = vsel %vm1577_vm1, %v1280_v6, 0 }
 0x3d7   :  { %4307 = vmatmul.mubr.msk.bf16.vlgmr.msra.gmra.mrb[8].mxu1 %vm1577_vm1, %v981_v23 }
 0x3d8   :  { %4311 = vmatpush3.bf16.xpose.msra.mxu1 %v1628_v60  ;;  %4312 = vmatprep.mubr.msk.bf16.mxu1 %vm4841_vm0, %v4840_v0 }
 0x3d9   :  { %4316 = vmatprep.subr.bf16.mxu1 %v4840_v0 }
 0x3df   :  { %4313 = vmatmul.mubr.msk.bf16.vlgmr.msra.gmra.mrb[12].mxu1 %vm1577_vm1, %v982_v62 }
 0x3e0   :  { %4317 = vmatpush3.bf16.xpose.msra.mxu1 %v1674_v3  ;;  %4318 = vmatprep.mubr.msk.bf16.mxu1 %vm4841_vm0, %v4840_v0 }
 0x3e1   :  { %4322 = vmatprep.subr.bf16.mxu1 %v4840_v0 }
 0x3e7   :  { %4319 = vmatmul.mubr.msk.bf16.vlgmr.msra.gmra.mrb[16].mxu1 %vm1577_vm1, %v983_v7 }
 0x3e8   :  { %4323 = vmatpush3.bf16.xpose.msra.mxu1 %v1720_v8  ;;  %4324 = vmatprep.mubr.msk.bf16.mxu1 %vm4841_vm0, %v4840_v0 }
 0x3e9   :  { %4328 = vmatprep.subr.bf16.mxu1 %v4840_v0 }
 0x3ef   :  { %4325 = vmatmul.mubr.msk.bf16.vlgmr.msra.gmra.mrb[20].mxu1 %vm1577_vm1, %v984_v9 }
 0x3f0   :  { %4330 = vmatprep.mubr.msk.bf16.mxu1 %vm4841_vm0, %v4840_v0 }
 0x4aa   :  { %v1618_v11 = vpop.f32.mrb[8].mxu1 }
 0x4ab   :  { %v4308_v12 = vpop.f32.mrb[9].mxu1  ;;  %v1763_v13 = vsel %vm1762_vm2, %v1618_v11, -inf }
 0x4ac   :  { %1764 = vmax.xlane.f32.xlu1 %v1763_v13  ;;  %v1621_v15 = vpop.f32.mrb[10].mxu1 }
 0x4ad   :  { %v4309_v18 = vpop.f32.mrb[11].mxu1 }
 0x4b2   :  { %v1664_v25 = vpop.f32.mrb[12].mxu1 }
 0x4b3   :  { %v4314_v28 = vpop.f32.mrb[13].mxu1  ;;  %v1766_v32 = vsel %vm1762_vm2, %v1664_v25, -inf }
 0x4b4   :  { %1767 = vmax.xlane.f32.xlu0 %v1766_v32  ;;  %v1667_v35 = vpop.f32.mrb[14].mxu1 }
 0x4b5   :  { %v4315_v38 = vpop.f32.mrb[15].mxu1 }
 0x4ba   :  { %v5341_v39 = vpop.f32.mrb[16].mxu1 }
 0x4bb   :  { %v4320_v41 = vpop.f32.mrb[17].mxu1  ;;  %v1769_v42 = vsel %vm1762_vm2, %v5341_v39, -inf }
 0x4bc   :  { %1770 = vmax.xlane.f32.xlu0 %v1769_v42  ;;  %v1713_v24 = vpop.f32.mrb[18].mxu1 }
 0x4bd   :  { %v4321_v44 = vpop.f32.mrb[19].mxu1  ;;  %1285 = vrot.lane.b32.xlu1 %v823_v40, %s4842_s3 }
 0x4c1   :  { %1289 = vrot.lane.b32.xlu1 %v5350_v19, %s5822_s25 }
 0x4c2   :  { %v1756_v45 = vpop.f32.mrb[20].mxu1 }
 0x4c3   :  { %v4326_v47 = vpop.f32.mrb[21].mxu1  ;;  %v1772_v37 = vsel %vm1762_vm2, %v1756_v45, -inf }
 0x4c4   :  { %1773 = vmax.xlane.f32.xlu0 %v1772_v37  ;;  %v1759_v48 = vpop.f32.mrb[22].mxu1 }
 0x4c5   :  { %v4327_v50 = vpop.f32.mrb[23].mxu1  ;;  %1291 = vrot.lane.b32.xlu1 %v823_v40, %s5822_s25 }
 0x4c9   :  { %1297 = vrot.lane.b32.xlu1 %v823_v40, %s4843_s9 }
 0x4cd   :  { %2291 = vrot.lane.b32.xlu1 %v5202_v14, %s4842_s3 }
 0x4d1   :  { %2295 = vrot.lane.b32.xlu1 %v5200_v10, %s5822_s25 }
 0x4d5   :  { %2301 = vrot.lane.b32.xlu1 %v5200_v10, %s4843_s9 }
 0x4da   :  { %1283 = vrot.lane.b32.xlu0 %v5350_v19, %s4842_s3 }
 0x4de   :  { %1295 = vrot.lane.b32.xlu0 %v5350_v19, %s4843_s9 }
 0x4e2   :  { %2289 = vrot.lane.b32.xlu0 %v5200_v10, %s4842_s3 }
 0x4e6   :  { %2297 = vrot.lane.b32.xlu0 %v5202_v14, %s5822_s25 }
 0x4ea   :  { %2303 = vrot.lane.b32.xlu0 %v5202_v14, %s4843_s9 }
 0x539   :  { %v1765_v31 = vpop.xlane.xlu1 %1764 }
 0x53a   :  { %v1775_v34 = vsub.f32 %v1618_v11, %v1765_v31 }
 0x53c   :  { %v1779_v51 = vmul.f32 1.442695, %v1775_v34 }
 0x53d   :  { %v1286_v52 = vpop.permute.xlu1 %1285 }
 0x53e   :  { %4551 = vpow2.f32 %v1779_v51 }
 0x541   :  { %v1768_v53 = vpop.xlane.xlu0 %1767  ;;  %v5373_v26 = vpop.permute.xlu1 %1289 }
 0x542   :  { %v1776_v55 = vsub.f32 %v1664_v25, %v1768_v53  ;;  %v1301_v48 = vcombine.low %v5350_v19, %v5373_v26  ;;  %v1302_v50 = vcombine.high %v5350_v19, %v5373_v26 }
 0x544   :  { %v1781_v56 = vmul.f32 1.442695, %v1776_v55 }
 0x545   :  { %v1292_v57 = vpop.permute.xlu1 %1291 }
 0x546   :  { %4553 = vpow2.f32 %v1781_v56  ;;  %v1369_v58 = vcombine.low %v823_v40, %v1292_v57  ;;  %v1370_v59 = vcombine.high %v823_v40, %v1292_v57 }
 0x548   :  { %v5375_v23 = vpop.eup %4551  ;;  %v1377_v22 = vrot.slane %v1369_v58, %v5246_v46  ;;  %v1384_v17 = vrot.slane %v1370_v59, %v5246_v46 }
 0x549   :  { %v1298_v60 = vpop.permute.xlu1 %1297  ;;  %v1787_v16 = vsel %vm1762_vm2, %v5375_v23, 0.0  ;;  %v1771_v63 = vpop.xlane.xlu0 %1770 }
 0x54a   :  { %v1385_v20 = vcombine.low %v1286_v52, %v1298_v60  ;;  %v1386_v21 = vcombine.high %v1286_v52, %v1298_v60  ;;  %1788 = vadd.xlane.f32.xlu1 %v1787_v16  ;;  %v1777_v24 = vsub.f32 %v5341_v39, %v1771_v63  ;;  %v5409_v39 = vmul.f32 0.17677669, %v5216_v27 }
 0x54b   :  { %v1309_v60 = vrot.slane %v1301_v48, %v5246_v46  ;;  %v1316_v16 = vrot.slane %v1302_v50, %v5246_v46 }
 0x54c   :  { %v1393_v61 = vrot.slane %v1385_v20, %v5246_v46  ;;  %v1400_v62 = vrot.slane %v1386_v21, %v5246_v46  ;;  %v1783_v56 = vmul.f32 1.442695, %v1777_v24 }
 0x54d   :  { %v5391_v15 = vpop.permute.xlu1 %2291 }
 0x54e   :  { %v1401_v29 = vcombine.low %v1377_v22, %v1393_v61  ;;  %v1402_v3 = vcombine.high %v1377_v22, %v1393_v61  ;;  %v1417_v30 = vcombine.low %v1384_v17, %v1400_v62  ;;  %v1418_v4 = vcombine.high %v1384_v17, %v1400_v62 }
 0x550   :  { %v5383_v5 = vpop.eup %4553  ;;  %v1409_v6 = vrot.slane %v1401_v29, %v5249_v54  ;;  %v1416_v7 = vrot.slane %v1402_v3, %v5249_v54  ;;  %v1425_v8 = vrot.slane %v1417_v30, %v5249_v54  ;;  %v1432_v49 = vrot.slane %v1418_v4, %v5249_v54 }
 0x551   :  { %v1774_v9 = vpop.xlane.xlu0 %1773  ;;  %v1790_v11 = vsel %vm1762_vm2, %v5383_v5, 0.0  ;;  %v2296_v31 = vpop.permute.xlu1 %2295 }
 0x552   :  { %v1505_v12 = vcombine.low %v1409_v6, %v1416_v7  ;;  %v4017_v13 = vcombine.high %v1409_v6, %v1416_v7  ;;  %v1778_v18 = vsub.f32 %v1756_v45, %v1774_v9  ;;  %1791 = vadd.xlane.f32.xlu0 %v1790_v11  ;;  %v1521_v25 = vcombine.low %v1425_v8, %v1432_v49 }
 0x553   :  { %v4018_v28 = vcombine.high %v1425_v8, %v1432_v49  ;;  %v2307_v26 = vcombine.low %v5200_v10, %v2296_v31  ;;  %v2308_v22 = vcombine.high %v5200_v10, %v2296_v31 }
 0x554   :  { %v1512_v32 = vrot.slane %v1505_v12, %v5246_v46  ;;  %v1520_v35 = vrot.slane %v4017_v13, %v5246_v46  ;;  %v1785_v38 = vmul.f32 1.442695, %v1778_v18  ;;  %v1528_v40 = vrot.slane %v1521_v25, %v5246_v46 }
 0x555   :  { %v1536_v41 = vrot.slane %v4018_v28, %v5246_v46  ;;  %v1284_v42 = vpop.permute.xlu0 %1283  ;;  %v2302_v61 = vpop.permute.xlu1 %2301  ;;  %v2315_v30 = vrot.slane %v2307_v26, %v5246_v46  ;;  %v2322_v11 = vrot.slane %v2308_v22, %v5246_v46 }
 0x556   :  { %4555 = vpow2.f32 %v1785_v38  ;;  %v1537_v44 = vcombine.low %v1512_v32, %v1520_v35  ;;  %v1538_v47 = vcombine.high %v1512_v32, %v1520_v35 }
 0x557   :  { %v1553_v37 = vcombine.low %v1528_v40, %v1536_v41  ;;  %v1554_v45 = vcombine.high %v1528_v40, %v1536_v41  ;;  %4557 = vpow2.f32 %v1783_v56 }
 0x558   :  { %v5403_v34 = vrot.slane %v1537_v44, %v5249_v54  ;;  %v5406_v51 = vrot.slane %v1538_v47, %v5249_v54 }
 0x559   :  { %v1296_v52 = vpop.permute.xlu0 %1295  ;;  %v5412_v53 = vrot.slane %v1553_v37, %v5249_v54  ;;  %v5415_v55 = vrot.slane %v1554_v45, %v5249_v54 }
 0x55a   :  { %v1317_v57 = vcombine.low %v1284_v42, %v1296_v52  ;;  %v1318_v19 = vcombine.high %v1284_v42, %v1296_v52 }
 0x55b   :  { %2138 = vrot.lane.b32.xlu1 %v5409_v39, %s4842_s3  ;;  %v1570_v58 = vcombine.high %v5403_v34, %v5412_v53  ;;  %v1571_v27 = vcombine.low %v5406_v51, %v5415_v55  ;;  %v1572_v59 = vcombine.high %v5406_v51, %v5415_v55 }
 0x55c   :  { %v1325_v20 = vrot.slane %v1317_v57, %v5246_v46  ;;  %v1332_v21 = vrot.slane %v1318_v19, %v5246_v46 }
 0x55d   :  { %v2290_v17 = vpop.permute.xlu0 %2289 }
 0x55e   :  { %v1333_v62 = vcombine.low %v1309_v60, %v1325_v20  ;;  %v1334_v63 = vcombine.high %v1309_v60, %v1325_v20  ;;  %v1349_v29 = vcombine.low %v1316_v16, %v1332_v21  ;;  %v1350_v3 = vcombine.high %v1316_v16, %v1332_v21 }
 0x55f   :  { %v2323_v4 = vcombine.low %v2290_v17, %v2302_v61  ;;  %v2324_v6 = vcombine.high %v2290_v17, %v2302_v61 }
 0x560   :  { %v5432_v7 = vpop.eup %4555  ;;  %v1341_v8 = vrot.slane %v1333_v62, %v5249_v54  ;;  %v1348_v49 = vrot.slane %v1334_v63, %v5249_v54  ;;  %v1357_v9 = vrot.slane %v1349_v29, %v5249_v54  ;;  %v1364_v10 = vrot.slane %v1350_v3, %v5249_v54 }
 0x561   :  { %v2331_v12 = vrot.slane %v2323_v4, %v5246_v46  ;;  %v2338_v13 = vrot.slane %v2324_v6, %v5246_v46  ;;  %v2298_v18 = vpop.permute.xlu0 %2297  ;;  %v1796_v25 = vsel %vm1762_vm2, %v5432_v7, 0.0  ;;  %v5459_v29 = vpop.eup %4557 }
 0x562   :  { %v1437_v28 = vcombine.low %v1341_v8, %v1348_v49  ;;  %v4015_v32 = vcombine.high %v1341_v8, %v1348_v49  ;;  %v1453_v35 = vcombine.low %v1357_v9, %v1364_v10  ;;  %v4016_v38 = vcombine.high %v1357_v9, %v1364_v10  ;;  %1797 = vadd.xlane.f32.xlu0 %v1796_v25 }
 0x563   :  { %v2339_v40 = vcombine.low %v2315_v30, %v2331_v12  ;;  %v2340_v41 = vcombine.high %v2315_v30, %v2331_v12  ;;  %v2355_v42 = vcombine.low %v2322_v11, %v2338_v13  ;;  %v2356_v24 = vcombine.high %v2322_v11, %v2338_v13 }
 0x564   :  { %v1444_v44 = vrot.slane %v1437_v28, %v5246_v46  ;;  %v1452_v47 = vrot.slane %v4015_v32, %v5246_v46  ;;  %v1460_v37 = vrot.slane %v1453_v35, %v5246_v46  ;;  %v1468_v45 = vrot.slane %v4016_v38, %v5246_v46 }
 0x565   :  { %v2347_v48 = vrot.slane %v2339_v40, %v5249_v54  ;;  %v2354_v50 = vrot.slane %v2340_v41, %v5249_v54  ;;  %v2363_v31 = vrot.slane %v2355_v42, %v5249_v54  ;;  %v2370_v52 = vrot.slane %v2356_v24, %v5249_v54  ;;  %v2304_v56 = vpop.permute.xlu0 %2303 }
 0x566   :  { %v2375_v57 = vcombine.low %v5202_v14, %v2298_v18  ;;  %v2376_v19 = vcombine.high %v5202_v14, %v2298_v18  ;;  %v2391_v26 = vcombine.low %v5391_v15, %v2304_v56  ;;  %v2392_v60 = vcombine.high %v5391_v15, %v2304_v56 }
 0x567   :  { %v2443_v16 = vcombine.low %v2347_v48, %v2354_v50  ;;  %v4031_v20 = vcombine.high %v2347_v48, %v2354_v50  ;;  %v2459_v21 = vcombine.low %v2363_v31, %v2370_v52  ;;  %v4032_v22 = vcombine.high %v2363_v31, %v2370_v52 }
 0x568   :  { %v2383_v17 = vrot.slane %v2375_v57, %v5246_v46  ;;  %v2390_v61 = vrot.slane %v2376_v19, %v5246_v46  ;;  %v2399_v62 = vrot.slane %v2391_v26, %v5246_v46  ;;  %v2406_v63 = vrot.slane %v2392_v60, %v5246_v46 }
 0x569   :  { %v2450_v14 = vrot.slane %v2443_v16, %v5246_v46  ;;  %v2458_v3 = vrot.slane %v4031_v20, %v5246_v46  ;;  %v2466_v15 = vrot.slane %v2459_v21, %v5246_v46  ;;  %v2474_v30 = vrot.slane %v4032_v22, %v5246_v46 }
 0x56a   :  { %v2407_v4 = vcombine.low %v2383_v17, %v2399_v62  ;;  %v2408_v6 = vcombine.high %v2383_v17, %v2399_v62  ;;  %v2423_v8 = vcombine.low %v2390_v61, %v2406_v63  ;;  %v2424_v49 = vcombine.high %v2390_v61, %v2406_v63 }
 0x56b   :  { %v1469_v9 = vcombine.low %v1444_v44, %v1452_v47  ;;  %v1485_v10 = vcombine.low %v1460_v37, %v1468_v45  ;;  %v2475_v11 = vcombine.low %v2450_v14, %v2458_v3  ;;  %v2491_v12 = vcombine.low %v2466_v15, %v2474_v30 }
 0x56c   :  { %v2415_v13 = vrot.slane %v2407_v4, %v5249_v54  ;;  %v2422_v18 = vrot.slane %v2408_v6, %v5249_v54  ;;  %v2431_v25 = vrot.slane %v2423_v8, %v5249_v54  ;;  %v2438_v28 = vrot.slane %v2424_v49, %v5249_v54 }
 0x56d   :  { %v1477_v32 = vrot.slane %v1469_v9, %v5249_v54  ;;  %v1493_v35 = vrot.slane %v1485_v10, %v5249_v54  ;;  %v2483_v38 = vrot.slane %v2475_v11, %v5249_v54  ;;  %v2499_v40 = vrot.slane %v2491_v12, %v5249_v54 }
 0x56e   :  { %v2511_v41 = vcombine.low %v2415_v13, %v2422_v18  ;;  %v4033_v42 = vcombine.high %v2415_v13, %v2422_v18  ;;  %v2527_v24 = vcombine.low %v2431_v25, %v2438_v28  ;;  %v4034_v48 = vcombine.high %v2431_v25, %v2438_v28 }
 0x56f   :  { %v1501_v50 = vcombine.low %v1477_v32, %v1493_v35  ;;  %v1569_v31 = vcombine.low %v5403_v34, %v5412_v53  ;;  %v1502_v52 = vcombine.high %v1477_v32, %v1493_v35  ;;  %v1470_v56 = vcombine.high %v1444_v44, %v1452_v47 }
 0x570   :  { %v2518_v57 = vrot.slane %v2511_v41, %v5246_v46  ;;  %v2526_v19 = vrot.slane %v4033_v42, %v5246_v46  ;;  %v2534_v26 = vrot.slane %v2527_v24, %v5246_v46  ;;  %v2542_v60 = vrot.slane %v4034_v48, %v5246_v46 }
 0x571   :  { %v1573_v16 = vpack.c.bf16 %v1569_v31, %v1501_v50  ;;  %v1574_v20 = vpack.c.bf16 %v1570_v58, %v1502_v52  ;;  %v1484_v21 = vrot.slane %v1470_v56, %v5249_v54  ;;  %v1486_v22 = vcombine.high %v1460_v37, %v1468_v45 }
 0x572   :  { %v2543_v17 = vcombine.low %v2518_v57, %v2526_v19  ;;  %v2559_v61 = vcombine.low %v2534_v26, %v2542_v60  ;;  %v2508_v62 = vcombine.high %v2483_v38, %v2499_v40  ;;  %v2476_v44 = vcombine.high %v2450_v14, %v2458_v3 }
 0x573   :  { %4329 = vmatpush3.bf16.msra.mxu1 %v1573_v16  ;;  %v1500_v47 = vrot.slane %v1486_v22, %v5249_v54  ;;  %v2492_v63 = vcombine.high %v2466_v15, %v2474_v30  ;;  %v2544_v4 = vcombine.high %v2518_v57, %v2526_v19  ;;  %v2560_v6 = vcombine.high %v2534_v26, %v2542_v60 }
 0x574   :  { %v2551_v8 = vrot.slane %v2543_v17, %v5249_v54  ;;  %v2567_v49 = vrot.slane %v2559_v61, %v5249_v54  ;;  %4334 = vmatprep.subr.bf16.mxu1 %v4840_v0  ;;  %v2490_v34 = vrot.slane %v2476_v44, %v5249_v54  ;;  %v2507_v14 = vcombine.low %v2483_v38, %v2499_v40 }
 0x575   :  { %v1503_v53 = vcombine.low %v1484_v21, %v1500_v47  ;;  %v1504_v58 = vcombine.high %v1484_v21, %v1500_v47  ;;  %v2506_v37 = vrot.slane %v2492_v63, %v5249_v54  ;;  %v2558_v45 = vrot.slane %v2544_v4, %v5249_v54 }
 0x576   :  { %v2575_v3 = vcombine.low %v2551_v8, %v2567_v49  ;;  %v2576_v9 = vcombine.high %v2551_v8, %v2567_v49  ;;  %v2574_v15 = vrot.slane %v2560_v6, %v5249_v54  ;;  %v1793_v51 = vsel %vm1762_vm2, %v5459_v29, 0.0 }
 0x577   :  { %v1575_v30 = vpack.c.bf16 %v1571_v27, %v1503_v53  ;;  %v5497_v10 = vpack.c.bf16 %v1572_v59, %v1504_v58  ;;  %v2509_v11 = vcombine.low %v2490_v34, %v2506_v37  ;;  %v2510_v12 = vcombine.high %v2490_v34, %v2506_v37 }
 0x578   :  { %2141 = vrot.lane.b32.xlu0 %v5409_v39, %s5822_s25  ;;  %v2579_v13 = vpack.c.bf16 %v2575_v3, %v2507_v14  ;;  %v5501_v18 = vpack.c.bf16 %v2576_v9, %v2508_v62  ;;  %v2577_v25 = vcombine.low %v2558_v45, %v2574_v15  ;;  %v2578_v28 = vcombine.high %v2558_v45, %v2574_v15 }
 0x57a   :  { %v2883_v32 = vsel %vm1577_vm1, %v2579_v13, 0  ;;  %v5504_v35 = vpack.c.bf16 %v2577_v25, %v2509_v11  ;;  %v5506_v27 = vpack.c.bf16 %v2578_v28, %v2510_v12 }
 0x57b   :  { %4353 = vmatpush3.bf16.xpose.msra.mxu0 %v2883_v32 }
 0x57c   :  { %4364 = vmatprep.subr.bf16.mxu0 %v4840_v0 }
 0x57f   :  { %1794 = vadd.xlane.f32.xlu1 %v1793_v51 }
 0x590   :  { %2144 = vrot.lane.b32.xlu1 %v5409_v39, %s4843_s9 }
 0x5d7   :  { %v1789_v55 = vpop.xlane.xlu1 %1788 }
 0x5d8   :  { %4559 = vrcp.f32 %v1789_v55 }
 0x5db   :  { %v2139_v50 = vpop.permute.xlu1 %2138 }
 0x5df   :  { %v1792_v59 = vpop.xlane.xlu0 %1791 }
 0x5e0   :  { %4561 = vrcp.f32 %v1792_v59  ;;  %v2975_v59 = vsel %vm1577_vm1, %v5504_v35, 0 }
 0x5e2   :  { %v4560_v38 = vpop.eup %4559 }
 0x5e3   :  { %v1803_v40 = vmul.f32 %v4560_v38, %v5375_v23 }
 0x5e5   :  { %v1807_v41 = vpack.c.bf16 %v1803_v40, %v1803_v40 }
 0x5e7   :  { %4331 = vmatmul.mubr.msk.bf16.vlgmr.msra.gmra.mrb[24].mxu1 %vm1762_vm2, %v1807_v41 }
 0x5e8   :  { %4335 = vmatpush3.bf16.msra.mxu1 %v1574_v20  ;;  %4336 = vmatprep.mubr.msk.bf16.mxu1 %vm4841_vm0, %v4840_v0 }
 0x5e9   :  { %4340 = vmatprep.subr.bf16.mxu1 %v4840_v0 }
 0x5ea   :  { %v4562_v42 = vpop.eup %4561 }
 0x5eb   :  { %v1804_v24 = vmul.f32 %v4562_v42, %v5383_v5 }
 0x5ed   :  { %v1808_v48 = vpack.c.bf16 %v1804_v24, %v1804_v24 }
 0x5ef   :  { %4337 = vmatmul.mubr.msk.bf16.vlgmr.msra.gmra.mrb[28].mxu1 %vm1762_vm2, %v1808_v48  ;;  %v1798_v23 = vpop.xlane.xlu0 %1797 }
 0x5f0   :  { %4341 = vmatpush3.bf16.msra.mxu1 %v1575_v30  ;;  %4342 = vmatprep.mubr.msk.bf16.mxu1 %vm4841_vm0, %v4840_v0 }
 0x5f1   :  { %4346 = vmatprep.subr.bf16.mxu1 %v4840_v0 }
 0x5f3   :  { %v2142_v31 = vpop.permute.xlu0 %2141 }
 0x5f4   :  { %v2147_v56 = vcombine.low %v5409_v39, %v2142_v31  ;;  %v2148_v57 = vcombine.high %v5409_v39, %v2142_v31 }
 0x5f6   :  { %v2155_v60 = vrot.slane %v2147_v56, %v5246_v46  ;;  %v2162_v16 = vrot.slane %v2148_v57, %v5246_v46 }
 0x60c   :  { %v1795_v52 = vpop.xlane.xlu1 %1794 }
 0x60d   :  { %4563 = vrcp.f32 %v1795_v52 }
 0x60e   :  { %4565 = vrcp.f32 %v1798_v23 }
 0x610   :  { %v2145_v19 = vpop.permute.xlu1 %2144 }
 0x611   :  { %v2163_v5 = vcombine.low %v2139_v50, %v2145_v19  ;;  %v2164_v26 = vcombine.high %v2139_v50, %v2145_v19 }
 0x613   :  { %v2171_v20 = vrot.slane %v2163_v5, %v5246_v46  ;;  %v2178_v21 = vrot.slane %v2164_v26, %v5246_v46 }
 0x615   :  { %v2179_v22 = vcombine.low %v2155_v60, %v2171_v20  ;;  %v2180_v17 = vcombine.high %v2155_v60, %v2171_v20  ;;  %v2195_v61 = vcombine.low %v2162_v16, %v2178_v21  ;;  %v2196_v62 = vcombine.high %v2162_v16, %v2178_v21 }
 0x617   :  { %v4564_v44 = vpop.eup %4563  ;;  %v2187_v47 = vrot.slane %v2179_v22, %v5249_v54  ;;  %v2194_v39 = vrot.slane %v2180_v17, %v5249_v54  ;;  %v2203_v63 = vrot.slane %v2195_v61, %v5249_v54  ;;  %v2210_v4 = vrot.slane %v2196_v62, %v5249_v54 }
 0x618   :  { %v1805_v6 = vmul.f32 %v4564_v44, %v5459_v29  ;;  %v4566_v37 = vpop.eup %4565 }
 0x619   :  { %v2215_v8 = vcombine.low %v2187_v47, %v2194_v39  ;;  %v4029_v49 = vcombine.high %v2187_v47, %v2194_v39  ;;  %v2231_v34 = vcombine.low %v2203_v63, %v2210_v4  ;;  %v4030_v53 = vcombine.high %v2203_v63, %v2210_v4 }
 0x61a   :  { %v1809_v58 = vpack.c.bf16 %v1805_v6, %v1805_v6  ;;  %v1806_v29 = vmul.f32 %v4566_v37, %v5432_v7  ;;  %v2929_v7 = vsel %vm1577_vm1, %v5501_v18, 0  ;;  %v3021_v18 = vsel %vm1577_vm1, %v5506_v27, 0 }
 0x61b   :  { %v2222_v45 = vrot.slane %v2215_v8, %v5246_v46  ;;  %v2230_v14 = vrot.slane %v4029_v49, %v5246_v46  ;;  %v2238_v3 = vrot.slane %v2231_v34, %v5246_v46  ;;  %v2246_v9 = vrot.slane %v4030_v53, %v5246_v46 }
 0x61c   :  { %4343 = vmatmul.mubr.msk.bf16.vlgmr.msra.gmra.mrb[32].mxu1 %vm1762_vm2, %v1809_v58  ;;  %v1810_v32 = vpack.c.bf16 %v1806_v29, %v1806_v29 }
 0x61d   :  { %v2247_v15 = vcombine.low %v2222_v45, %v2230_v14  ;;  %v2263_v30 = vcombine.low %v2238_v3, %v2246_v9  ;;  %4347 = vmatpush3.bf16.msra.mxu1 %v5497_v10  ;;  %4348 = vmatprep.mubr.msk.bf16.mxu1 %vm4841_vm0, %v4840_v0  ;;  %v2248_v11 = vcombine.high %v2222_v45, %v2230_v14 }
 0x61e   :  { %4358 = vmatprep.subr.bf16.mxu1 %v4840_v0  ;;  %v2264_v12 = vcombine.high %v2238_v3, %v2246_v9 }
 0x61f   :  { %v2255_v13 = vrot.slane %v2247_v15, %v5249_v54  ;;  %v2271_v25 = vrot.slane %v2263_v30, %v5249_v54  ;;  %v2262_v55 = vrot.slane %v2248_v11, %v5249_v54 }
 0x620   :  { %v2278_v10 = vrot.slane %v2264_v12, %v5249_v54 }
 0x621   :  { %v2279_v28 = vcombine.low %v2255_v13, %v2271_v25  ;;  %v2280_v38 = vcombine.high %v2255_v13, %v2271_v25 }
 0x622   :  { %v2281_v40 = vcombine.low %v2262_v55, %v2278_v10  ;;  %v2282_v35 = vcombine.high %v2262_v55, %v2278_v10 }
 0x623   :  { %v2283_v51 = vpack.c.bf16 %v2279_v28, %v2279_v28  ;;  %v2284_v41 = vpack.c.bf16 %v2280_v38, %v2280_v38 }
 0x624   :  { %4349 = vmatmul.mubr.msk.bf16.vlgmr.msra.gmra.mrb[36].mxu1 %vm1762_vm2, %v1810_v32  ;;  %v2285_v42 = vpack.c.bf16 %v2281_v40, %v2281_v40  ;;  %v2286_v24 = vpack.c.bf16 %v2282_v35, %v2282_v35 }
 0x625   :  { %4355 = vmatmul.mubr.msk.bf16.vlgmr.msra.gmra.mrb[12].mxu0 %vm1577_vm1, %v2283_v51  ;;  %4360 = vmatprep.mubr.msk.bf16.mxu1 %vm4841_vm0, %v4840_v0 }
 0x626   :  { %4359 = vmatpush3.bf16.xpose.msra.mxu1 %v2929_v7  ;;  %4365 = vmatpush3.bf16.xpose.msra.mxu0 %v2975_v59 }
 0x627   :  { %4366 = vmatprep.mubr.msk.bf16.mxu0 %vm4841_vm0, %v4840_v0  ;;  %4370 = vmatprep.subr.bf16.mxu1 %v4840_v0 }
 0x628   :  { %4376 = vmatprep.subr.bf16.mxu0 %v4840_v0 }
 0x62d   :  { %4361 = vmatmul.mubr.msk.bf16.vlgmr.msra.gmra.mrb[40].mxu1 %vm1577_vm1, %v2284_v41  ;;  %4367 = vmatmul.mubr.msk.bf16.vlgmr.msra.gmra.mrb[16].mxu0 %vm1577_vm1, %v2285_v42 }
 0x62e   :  { %4371 = vmatpush3.bf16.xpose.msra.mxu1 %v3021_v18  ;;  %4372 = vmatprep.mubr.msk.bf16.mxu1 %vm4841_vm0, %v4840_v0 }
 0x62f   :  { %4382 = vmatprep.subr.bf16.mxu1 %v4840_v0  ;;  %4378 = vmatprep.mubr.msk.bf16.mxu0 %vm4841_vm0, %v4840_v0 }
 0x635   :  { %4373 = vmatmul.mubr.msk.bf16.vlgmr.msra.gmra.mrb[44].mxu1 %vm1577_vm1, %v2286_v24 }
 0x636   :  { %4384 = vmatprep.mubr.msk.bf16.mxu1 %vm4841_vm0, %v4840_v0 }
 0x6ba   :  { %v1848_v48 = vpop.f32.mrb[24].mxu1 }
 0x6bb   :  { %v4332_v23 = vpop.f32.mrb[25].mxu1 }
 0x6bc   :  { %v1851_v50 = vpop.f32.mrb[26].mxu1 }
 0x6bd   :  { %v4333_v27 = vpop.f32.mrb[27].mxu1 }
 0x6c2   :  { %v1891_v31 = vpop.f32.mrb[28].mxu1 }
 0x6c3   :  { %v4338_v52 = vpop.f32.mrb[29].mxu1 }
 0x6c4   :  { %v1894_v56 = vpop.f32.mrb[30].mxu1 }
 0x6c5   :  { %v4339_v57 = vpop.f32.mrb[31].mxu1 }
 0x6ef   :  { %v1934_v19 = vpop.f32.mrb[32].mxu1 }
 0x6f0   :  { %v1983_v5 = vcombine.low %v1848_v48, %v1934_v19  ;;  %v1984_v26 = vcombine.high %v1848_v48, %v1934_v19  ;;  %v4344_v60 = vpop.f32.mrb[33].mxu1 }
 0x6f1   :  { %v1937_v16 = vpop.f32.mrb[34].mxu1 }
 0x6f2   :  { %v4345_v20 = vpop.f32.mrb[35].mxu1  ;;  %v1991_v63 = vrot.slane %v1983_v5, %v5246_v46  ;;  %v1998_v4 = vrot.slane %v1984_v26, %v5246_v46 }
 0x6f7   :  { %v1977_v21 = vpop.f32.mrb[36].mxu1 }
 0x6f8   :  { %v1999_v22 = vcombine.low %v1891_v31, %v1977_v21  ;;  %v2000_v17 = vcombine.high %v1891_v31, %v1977_v21  ;;  %v4350_v61 = vpop.f32.mrb[37].mxu1  ;;  %v5572_v62 = vpop.f32.mrb[12].mxu0 }
 0x6f9   :  { %v1980_v44 = vpop.f32.mrb[38].mxu1  ;;  %v4356_v47 = vpop.f32.mrb[13].mxu0  ;;  %v3063_v39 = vsel %vm1762_vm2, %v5572_v62, -inf }
 0x6fa   :  { %v2007_v6 = vrot.slane %v1999_v22, %v5246_v46  ;;  %v2014_v8 = vrot.slane %v2000_v17, %v5246_v46  ;;  %v4351_v49 = vpop.f32.mrb[39].mxu1  ;;  %3064 = vmax.xlane.f32.xlu0 %v3063_v39  ;;  %v2922_v34 = vpop.f32.mrb[14].mxu0 }
 0x6fb   :  { %v4357_v53 = vpop.f32.mrb[15].mxu0 }
 0x6fc   :  { %v2015_v58 = vcombine.low %v1991_v63, %v2007_v6  ;;  %v2016_v37 = vcombine.high %v1991_v63, %v2007_v6  ;;  %v2031_v45 = vcombine.low %v1998_v4, %v2014_v8  ;;  %v2032_v14 = vcombine.high %v1998_v4, %v2014_v8 }
 0x6fe   :  { %v2023_v3 = vrot.slane %v2015_v58, %v5249_v54  ;;  %v2030_v9 = vrot.slane %v2016_v37, %v5249_v54  ;;  %v2039_v15 = vrot.slane %v2031_v45, %v5249_v54  ;;  %v2046_v30 = vrot.slane %v2032_v14, %v5249_v54 }
 0x700   :  { %v2051_v29 = vcombine.low %v2023_v3, %v2030_v9  ;;  %v4027_v11 = vcombine.high %v2023_v3, %v2030_v9  ;;  %v2067_v12 = vcombine.low %v2039_v15, %v2046_v30  ;;  %v4028_v13 = vcombine.high %v2039_v15, %v2046_v30  ;;  %v2965_v25 = vpop.f32.mrb[40].mxu1  ;;  %v3011_v28 = vpop.f32.mrb[16].mxu0 }
 0x701   :  { %v4362_v32 = vpop.f32.mrb[41].mxu1  ;;  %v3066_v51 = vsel %vm1762_vm2, %v2965_v25, -inf  ;;  %v4368_v55 = vpop.f32.mrb[17].mxu0  ;;  %v3069_v10 = vsel %vm1762_vm2, %v3011_v28, -inf }
 0x702   :  { %3067 = vmax.xlane.f32.xlu1 %v3066_v51  ;;  %v2968_v7 = vpop.f32.mrb[42].mxu1  ;;  %3070 = vmax.xlane.f32.xlu0 %v3069_v10  ;;  %v3014_v59 = vpop.f32.mrb[18].mxu0  ;;  %v2058_v38 = vrot.slane %v2051_v29, %v5246_v46  ;;  %v2066_v40 = vrot.slane %v4027_v11, %v5246_v46  ;;  %v2074_v41 = vrot.slane %v2067_v12, %v5246_v46 }
 0x703   :  { %v4363_v42 = vpop.f32.mrb[43].mxu1  ;;  %v4369_v18 = vpop.f32.mrb[19].mxu0  ;;  %v2082_v35 = vrot.slane %v4028_v13, %v5246_v46 }
 0x704   :  { %v2084_v24 = vcombine.high %v2058_v38, %v2066_v40  ;;  %v2083_v48 = vcombine.low %v2058_v38, %v2066_v40 }
 0x705   :  { %v2100_v23 = vcombine.high %v2074_v41, %v2082_v35  ;;  %v2099_v50 = vcombine.low %v2074_v41, %v2082_v35 }
 0x706   :  { %v5591_v27 = vrot.slane %v2084_v24, %v5249_v54  ;;  %v5594_v31 = vrot.slane %v2083_v48, %v5249_v54 }
 0x707   :  { %v5597_v52 = vrot.slane %v2100_v23, %v5249_v54  ;;  %v5600_v56 = vrot.slane %v2099_v50, %v5249_v54 }
 0x708   :  { %v3057_v57 = vpop.f32.mrb[44].mxu1 }
 0x709   :  { %v4374_v19 = vpop.f32.mrb[45].mxu1  ;;  %v3072_v5 = vsel %vm1762_vm2, %v3057_v57, -inf  ;;  %v2117_v26 = vcombine.low %v5591_v27, %v5597_v52  ;;  %v2115_v60 = vcombine.low %v5594_v31, %v5600_v56  ;;  %v2116_v16 = vcombine.high %v5594_v31, %v5600_v56 }
 0x70a   :  { %v3060_v20 = vpop.f32.mrb[46].mxu1  ;;  %3073 = vmax.xlane.f32.xlu0 %v3072_v5  ;;  %v2118_v21 = vcombine.high %v5591_v27, %v5597_v52 }
 0x70b   :  { %v4375_v22 = vpop.f32.mrb[47].mxu1 }
 0x713   :  { %2587 = vrot.lane.b32.xlu1 %v5239_v36, %s4842_s3 }
 0x717   :  { %2591 = vrot.lane.b32.xlu1 %v5234_v33, %s5822_s25 }
 0x71b   :  { %2593 = vrot.lane.b32.xlu1 %v5239_v36, %s5822_s25 }
 0x787   :  { %v3065_v17 = vpop.xlane.xlu0 %3064 }
 0x788   :  { %v3075_v61 = vsub.f32 %v5572_v62, %v3065_v17 }
 0x78a   :  { %v3079_v44 = vmul.f32 1.442695, %v3075_v61 }
 0x78c   :  { %4567 = vpow2.f32 %v3079_v44 }
 0x78f   :  { %v3068_v47 = vpop.xlane.xlu1 %3067  ;;  %v3071_v62 = vpop.xlane.xlu0 %3070 }
 0x790   :  { %v3076_v39 = vsub.f32 %v2965_v25, %v3068_v47  ;;  %v3077_v34 = vsub.f32 %v3011_v28, %v3071_v62 }
 0x792   :  { %v3081_v63 = vmul.f32 1.442695, %v3076_v39  ;;  %v3083_v58 = vmul.f32 1.442695, %v3077_v34 }
 0x793   :  { %v2588_v30 = vpop.permute.xlu1 %2587 }
 0x794   :  { %4569 = vpow2.f32 %v3081_v63 }
 0x795   :  { %4571 = vpow2.f32 %v3083_v58 }
 0x796   :  { %v5618_v4 = vpop.eup %4567 }
 0x797   :  { %v3087_v6 = vsel %vm1762_vm2, %v5618_v4, 0.0  ;;  %v3074_v53 = vpop.xlane.xlu0 %3073  ;;  %v2592_v29 = vpop.permute.xlu1 %2591 }
 0x798   :  { %3088 = vadd.xlane.f32.xlu0 %v3087_v6  ;;  %v3078_v37 = vsub.f32 %v3057_v57, %v3074_v53  ;;  %v2603_v25 = vcombine.low %v5234_v33, %v2592_v29  ;;  %v2604_v28 = vcombine.high %v5234_v33, %v2592_v29 }
 0x79a   :  { %v3085_v45 = vmul.f32 1.442695, %v3078_v37  ;;  %v2611_v59 = vrot.slane %v2603_v25, %v5246_v46  ;;  %v2618_v38 = vrot.slane %v2604_v28, %v5246_v46 }
 0x79b   :  { %v2594_v12 = vpop.permute.xlu1 %2593 }
 0x79c   :  { %4573 = vpow2.f32 %v3085_v45  ;;  %v2671_v7 = vcombine.low %v5239_v36, %v2594_v12  ;;  %v2672_v42 = vcombine.high %v5239_v36, %v2594_v12 }
 0x79e   :  { %v5622_v8 = vpop.eup %4569  ;;  %v2679_v23 = vrot.slane %v2671_v7, %v5246_v46 }
 0x79f   :  { %v3090_v49 = vsel %vm1762_vm2, %v5622_v8, 0.0  ;;  %v5632_v14 = vpop.eup %4571 }
 0x7a0   :  { %3091 = vadd.xlane.f32.xlu1 %v3090_v49  ;;  %v3093_v3 = vsel %vm1762_vm2, %v5632_v14, 0.0 }
 0x7a6   :  { %v5636_v9 = vpop.eup %4573 }
 0x7a7   :  { %v3096_v15 = vsel %vm1762_vm2, %v5636_v9, 0.0 }
 0x7ae   :  { %2585 = vrot.lane.b32.xlu0 %v5234_v33, %s4842_s3 }
 0x7b1   :  { %2599 = vrot.lane.b32.xlu1 %v5239_v36, %s4843_s9  ;;  %v2686_v36 = vrot.slane %v2672_v42, %v5246_v46 }
 0x7b2   :  { %2597 = vrot.lane.b32.xlu0 %v5234_v33, %s4843_s9 }
 0x7d1   :  { %3094 = vadd.xlane.f32.xlu0 %v3093_v3 }
 0x7d5   :  { %3097 = vadd.xlane.f32.xlu1 %v3096_v15 }
 0x825   :  { %v3089_v11 = vpop.xlane.xlu0 %3088 }
 0x826   :  { %4575 = vrcp.f32 %v3089_v11 }
 0x829   :  { %v2586_v13 = vpop.permute.xlu0 %2585 }
 0x82d   :  { %v3092_v32 = vpop.xlane.xlu1 %3091  ;;  %v2598_v51 = vpop.permute.xlu0 %2597 }
 0x82e   :  { %v2619_v55 = vcombine.low %v2586_v13, %v2598_v51  ;;  %v2620_v10 = vcombine.high %v2586_v13, %v2598_v51  ;;  %4577 = vrcp.f32 %v3092_v32 }
 0x830   :  { %v2627_v40 = vrot.slane %v2619_v55, %v5246_v46  ;;  %v2634_v41 = vrot.slane %v2620_v10, %v5246_v46  ;;  %v4576_v51 = vpop.eup %4575 }
 0x831   :  { %v2600_v18 = vpop.permute.xlu1 %2599 }
 0x832   :  { %v2635_v35 = vcombine.low %v2611_v59, %v2627_v40  ;;  %v2636_v24 = vcombine.high %v2611_v59, %v2627_v40  ;;  %v2651_v33 = vcombine.low %v2618_v38, %v2634_v41  ;;  %v2652_v48 = vcombine.high %v2618_v38, %v2634_v41 }
 0x833   :  { %v2687_v50 = vcombine.low %v2588_v30, %v2600_v18  ;;  %v2688_v57 = vcombine.high %v2588_v30, %v2600_v18 }
 0x834   :  { %v2643_v19 = vrot.slane %v2635_v35, %v5249_v54  ;;  %v2650_v5 = vrot.slane %v2636_v24, %v5249_v54  ;;  %v2659_v20 = vrot.slane %v2651_v33, %v5249_v54  ;;  %v2666_v22 = vrot.slane %v2652_v48, %v5249_v54 }
 0x835   :  { %v2695_v17 = vrot.slane %v2687_v50, %v5246_v46  ;;  %v2702_v61 = vrot.slane %v2688_v57, %v5246_v46 }
 0x836   :  { %v2739_v44 = vcombine.low %v2643_v19, %v2650_v5  ;;  %v4035_v47 = vcombine.high %v2643_v19, %v2650_v5  ;;  %v2755_v39 = vcombine.low %v2659_v20, %v2666_v22  ;;  %v4036_v63 = vcombine.high %v2659_v20, %v2666_v22 }
 0x837   :  { %v2703_v6 = vcombine.low %v2679_v23, %v2695_v17  ;;  %v2704_v49 = vcombine.high %v2679_v23, %v2695_v17  ;;  %v2719_v62 = vcombine.low %v2686_v36, %v2702_v61  ;;  %v2720_v34 = vcombine.high %v2686_v36, %v2702_v61 }
 0x838   :  { %v2746_v53 = vrot.slane %v2739_v44, %v5246_v46  ;;  %v2754_v58 = vrot.slane %v4035_v47, %v5246_v46  ;;  %v2762_v37 = vrot.slane %v2755_v39, %v5246_v46  ;;  %v2770_v45 = vrot.slane %v4036_v63, %v5246_v46  ;;  %v4578_v38 = vpop.eup %4577 }
 0x839   :  { %v2711_v3 = vrot.slane %v2703_v6, %v5249_v54  ;;  %v2718_v15 = vrot.slane %v2704_v49, %v5249_v54  ;;  %v2727_v30 = vrot.slane %v2719_v62, %v5249_v54  ;;  %v2734_v29 = vrot.slane %v2720_v34, %v5249_v54 }
 0x83a   :  { %v2771_v28 = vcombine.low %v2746_v53, %v2754_v58  ;;  %v2787_v32 = vcombine.low %v2762_v37, %v2770_v45  ;;  %v2772_v41 = vcombine.high %v2746_v53, %v2754_v58  ;;  %v2788_v42 = vcombine.high %v2762_v37, %v2770_v45 }
 0x83b   :  { %v2807_v11 = vcombine.low %v2711_v3, %v2718_v15  ;;  %v4037_v12 = vcombine.high %v2711_v3, %v2718_v15  ;;  %v2823_v13 = vcombine.low %v2727_v30, %v2734_v29  ;;  %v4038_v25 = vcombine.high %v2727_v30, %v2734_v29 }
 0x83c   :  { %v2779_v35 = vrot.slane %v2771_v28, %v5249_v54  ;;  %v2795_v24 = vrot.slane %v2787_v32, %v5249_v54  ;;  %v2786_v5 = vrot.slane %v2772_v41, %v5249_v54  ;;  %v2802_v20 = vrot.slane %v2788_v42, %v5249_v54  ;;  %v4493_v28 = vld [vmem:[#allocation13 + $0x10] sm:$0xff]   ;;  %v4496_v32 = vld [vmem:[#allocation13 + $0x28] sm:$0xff]  }
 0x83d   :  { %v2814_v55 = vrot.slane %v2807_v11, %v5246_v46  ;;  %v2822_v10 = vrot.slane %v4037_v12, %v5246_v46  ;;  %v2830_v7 = vrot.slane %v2823_v13, %v5246_v46  ;;  %v2838_v59 = vrot.slane %v4038_v25, %v5246_v46  ;;  %v4491_v13 = vld [vmem:[#allocation13] sm:$0xff]   ;;  %v4492_v25 = vld [vmem:[#allocation13 + $0x8] sm:$0xff]  }
 0x83e   :  { %v2803_v22 = vcombine.low %v2779_v35, %v2795_v24  ;;  %v2804_v17 = vcombine.high %v2779_v35, %v2795_v24  ;;  %v3103_v44 = vmul.f32 %v4576_v51, %v5618_v4  ;;  %v3104_v47 = vmul.f32 %v4578_v38, %v5622_v8 }
 0x83f   :  { %v2839_v40 = vcombine.low %v2814_v55, %v2822_v10  ;;  %v2840_v18 = vcombine.high %v2814_v55, %v2822_v10  ;;  %v2855_v33 = vcombine.low %v2830_v7, %v2838_v59  ;;  %v2856_v48 = vcombine.high %v2830_v7, %v2838_v59 }
 0x840   :  { %v2805_v62 = vcombine.low %v2786_v5, %v2802_v20  ;;  %v2806_v34 = vcombine.high %v2786_v5, %v2802_v20  ;;  %v3107_v53 = vpack.c.bf16 %v3103_v44, %v3103_v44  ;;  %v3108_v58 = vpack.c.bf16 %v3104_v47, %v3104_v47 }
 0x841   :  { %v2847_v23 = vrot.slane %v2839_v40, %v5249_v54  ;;  %v2863_v50 = vrot.slane %v2855_v33, %v5249_v54  ;;  %v2854_v57 = vrot.slane %v2840_v18, %v5249_v54  ;;  %v2870_v19 = vrot.slane %v2856_v48, %v5249_v54 }
 0x843   :  { %v2871_v36 = vcombine.low %v2847_v23, %v2863_v50  ;;  %v2872_v61 = vcombine.high %v2847_v23, %v2863_v50  ;;  %v2873_v6 = vcombine.low %v2854_v57, %v2870_v19  ;;  %v2874_v49 = vcombine.high %v2854_v57, %v2870_v19 }
 0x845   :  { %v2875_v39 = vpack.c.bf16 %v2871_v36, %v2803_v22  ;;  %v2876_v63 = vpack.c.bf16 %v2872_v61, %v2804_v17  ;;  %v2877_v37 = vpack.c.bf16 %v2873_v6, %v2805_v62  ;;  %v2878_v45 = vpack.c.bf16 %v2874_v49, %v2806_v34 }
 0x847   :  { %4377 = vmatpush3.bf16.msra.mxu0 %v2875_v39  ;;  %4383 = vmatpush3.bf16.msra.mxu1 %v2876_v63 }
 0x848   :  { %4388 = vmatprep.subr.bf16.mxu0 %v4840_v0  ;;  %4394 = vmatprep.subr.bf16.mxu1 %v4840_v0 }
 0x84a   :  { %4379 = vmatmul.mubr.msk.bf16.vlgmr.msra.gmra.mrb[20].mxu0 %vm1762_vm2, %v3107_v53  ;;  %4385 = vmatmul.mubr.msk.bf16.vlgmr.msra.gmra.mrb[48].mxu1 %vm1762_vm2, %v3108_v58 }
 0x84b   :  { %4389 = vmatpush3.bf16.msra.mxu0 %v2877_v37  ;;  %4395 = vmatpush3.bf16.msra.mxu1 %v2878_v45 }
 0x84c   :  { %4390 = vmatprep.mubr.msk.bf16.mxu0 %vm4841_vm0, %v4840_v0  ;;  %4396 = vmatprep.mubr.msk.bf16.mxu1 %vm4841_vm0, %v4840_v0 }
 0x84d   :  { %4400 = vmatprep.subr.bf16.mxu0 %v4840_v0 }
 0x85e   :  { %v3095_v4 = vpop.xlane.xlu0 %3094 }
 0x85f   :  { %4579 = vrcp.f32 %v3095_v4  ;;  %v4497_v4 = vld [vmem:[#allocation13 + $0x30] sm:$0xff]  }
 0x862   :  { %v3098_v8 = vpop.xlane.xlu1 %3097 }
 0x863   :  { %4581 = vrcp.f32 %v3098_v8 }
 0x869   :  { %v4580_v3 = vpop.eup %4579 }
 0x86a   :  { %v3105_v15 = vmul.f32 %v4580_v3, %v5632_v14  ;;  %v4494_v14 = vld [vmem:[#allocation13 + $0x18] sm:$0xff]  }
 0x86c   :  { %v3109_v30 = vpack.c.bf16 %v3105_v15, %v3105_v15 }
 0x86d   :  { %v4582_v29 = vpop.eup %4581 }
 0x86e   :  { %v3106_v11 = vmul.f32 %v4582_v29, %v5636_v9  ;;  %4391 = vmatmul.mubr.msk.bf16.vlgmr.msra.gmra.mrb[24].mxu0 %vm1762_vm2, %v3109_v30  ;;  %v4495_v9 = vld [vmem:[#allocation13 + $0x20] sm:$0xff]  }
 0x86f   :  { %4416 = vmatprep.mubr.msk.bf16.mxu0 %vm4841_vm0, %v4840_v0  ;;  %4401 = vmatpush3.bf16.msra.mxu0 %v4491_v13 }
 0x870   :  { %v3110_v12 = vpack.c.bf16 %v3106_v11, %v3106_v11  ;;  %4402 = vmatprep.subr.bf16.mxu0 %v4840_v0 }
 0x872   :  { %4397 = vmatmul.mubr.msk.bf16.vlgmr.msra.gmra.mrb[52].mxu1 %vm1762_vm2, %v3110_v12 }
 0x873   :  { %4403 = vmatpush3.bf16.msra.mxu0 %v4492_v25 }
 0x874   :  { %4404 = vmatprep.subr.bf16.mxu0 %v4840_v0 }
 0x877   :  { %4405 = vmatpush3.bf16.msra.mxu0 %v4493_v28 }
 0x878   :  { %4406 = vmatprep.subr.bf16.mxu0 %v4840_v0 }
 0x87b   :  { %4407 = vmatpush3.bf16.msra.mxu0 %v4494_v14 }
 0x87c   :  { %4408 = vmatprep.subr.bf16.mxu0 %v4840_v0 }
 0x87f   :  { %4409 = vmatpush3.bf16.msra.mxu0 %v4495_v9 }
 0x880   :  { %4410 = vmatprep.subr.bf16.mxu0 %v4840_v0 }
 0x883   :  { %4411 = vmatpush3.bf16.msra.mxu0 %v4496_v32  ;;  %v4498_v32 = vld [vmem:[#allocation13 + $0x38] sm:$0xff]  }
 0x884   :  { %4412 = vmatprep.subr.bf16.mxu0 %v4840_v0 }
 0x887   :  { %4413 = vmatpush3.bf16.msra.mxu0 %v4497_v4  ;;  %v4522_v4 = vld [vmem:[#allocation14 + $0x74] ss:$8 sps:$4 sm:$0xff]  }
 0x888   :  { %4414 = vmatprep.subr.bf16.mxu0 %v4840_v0 }
 0x88b   :  { %4415 = vmatpush3.bf16.msra.mxu0 %v4498_v32 }
 0x91d   :  { %v3148_v51 = vpop.f32.mrb[20].mxu0  ;;  %v3191_v55 = vpop.f32.mrb[48].mxu1 }
 0x91e   :  { %v4380_v10 = vpop.f32.mrb[21].mxu0  ;;  %v4386_v7 = vpop.f32.mrb[49].mxu1 }
 0x91f   :  { %v3151_v59 = vpop.f32.mrb[22].mxu0  ;;  %v3194_v38 = vpop.f32.mrb[50].mxu1 }
 0x920   :  { %v4381_v40 = vpop.f32.mrb[23].mxu0  ;;  %v4387_v41 = vpop.f32.mrb[51].mxu1 }
 0x941   :  { %v3234_v42 = vpop.f32.mrb[24].mxu0 }
 0x942   :  { %v3283_v18 = vcombine.low %v3148_v51, %v3234_v42  ;;  %v3284_v35 = vcombine.high %v3148_v51, %v3234_v42  ;;  %v4392_v24 = vpop.f32.mrb[25].mxu0 }
 0x943   :  { %v3237_v33 = vpop.f32.mrb[26].mxu0 }
 0x944   :  { %v4393_v48 = vpop.f32.mrb[27].mxu0  ;;  %v3291_v20 = vrot.slane %v3283_v18, %v5246_v46  ;;  %v3298_v22 = vrot.slane %v3284_v35, %v5246_v46 }
 0x945   :  { %v3277_v23 = vpop.f32.mrb[52].mxu1 }
 0x946   :  { %v3299_v50 = vcombine.low %v3191_v55, %v3277_v23  ;;  %v3300_v57 = vcombine.high %v3191_v55, %v3277_v23  ;;  %v4398_v19 = vpop.f32.mrb[53].mxu1 }
 0x947   :  { %v3280_v5 = vpop.f32.mrb[54].mxu1 }
 0x948   :  { %v3307_v36 = vrot.slane %v3299_v50, %v5246_v46  ;;  %v3314_v17 = vrot.slane %v3300_v57, %v5246_v46  ;;  %v4399_v61 = vpop.f32.mrb[55].mxu1  ;;  %v4049_v50 = vld [vmem:[%s5800_s13] ss:$0 sm:$0xff] }
 0x949   :  { %v4499_v61 = vld [vmem:[#allocation14] ss:$8 sps:$4 sm:$0xff]  }
 0x94a   :  { %v3315_v44 = vcombine.low %v3291_v20, %v3307_v36  ;;  %v3316_v47 = vcombine.high %v3291_v20, %v3307_v36  ;;  %v3331_v39 = vcombine.low %v3298_v22, %v3314_v17  ;;  %v3332_v63 = vcombine.high %v3298_v22, %v3314_v17 }
 0x94c   :  { %v3323_v6 = vrot.slane %v3315_v44, %v5249_v54  ;;  %v3330_v49 = vrot.slane %v3316_v47, %v5249_v54  ;;  %v3339_v62 = vrot.slane %v3331_v39, %v5249_v54  ;;  %v3346_v34 = vrot.slane %v3332_v63, %v5249_v54  ;;  %v4502_v44 = vld [vmem:[#allocation14 + $0x10] ss:$8 sps:$4 sm:$0xff]   ;;  %v4504_v47 = vld [vmem:[#allocation14 + $0x14] ss:$8 sps:$4 sm:$0xff]   ;;  %v4507_v39 = vld [vmem:[#allocation14 + $0x24] ss:$8 sps:$4 sm:$0xff]  }
 0x94d   :  { %v4510_v63 = vld [vmem:[#allocation14 + $0x34] ss:$8 sps:$4 sm:$0xff]  }
 0x94e   :  { %v3351_v53 = vcombine.low %v3323_v6, %v3330_v49  ;;  %v4047_v58 = vcombine.high %v3323_v6, %v3330_v49  ;;  %v3367_v37 = vcombine.low %v3339_v62, %v3346_v34  ;;  %v4048_v45 = vcombine.high %v3339_v62, %v3346_v34  ;;  %v4508_v6 = vld [vmem:[#allocation14 + $0x30] ss:$8 sps:$4 sm:$0xff]   ;;  %v4513_v49 = vld [vmem:[#allocation14 + $0x44] ss:$8 sps:$4 sm:$0xff]   ;;  %v4511_v34 = vld [vmem:[#allocation14 + $0x40] ss:$8 sps:$4 sm:$0xff]  }
 0x94f   :  { %v4846_v62 = vmov 0  }
 0x950   :  { %v3358_v8 = vrot.slane %v3351_v53, %v5246_v46  ;;  %v3366_v3 = vrot.slane %v4047_v58, %v5246_v46  ;;  %v3374_v15 = vrot.slane %v3367_v37, %v5246_v46  ;;  %v3382_v30 = vrot.slane %v4048_v45, %v5246_v46  ;;  %3734 = vmatprep.mubr.bf16.mxu1 %v4846_v62  ;;  %v4516_v53 = vld [vmem:[#allocation14 + $0x54] ss:$8 sps:$4 sm:$0xff]   ;;  %v4514_v58 = vld [vmem:[#allocation14 + $0x50] ss:$8 sps:$4 sm:$0xff]   ;;  %v4519_v37 = vld [vmem:[#allocation14 + $0x64] ss:$8 sps:$4 sm:$0xff]  }
 0x951   :  { %v4517_v45 = vld [vmem:[#allocation14 + $0x60] ss:$8 sps:$4 sm:$0xff]  }
 0x952   :  { %v3384_v29 = vcombine.high %v3358_v8, %v3366_v3  ;;  %v3400_v11 = vcombine.high %v3374_v15, %v3382_v30  ;;  %v3383_v12 = vcombine.low %v3358_v8, %v3366_v3  ;;  %v3399_v13 = vcombine.low %v3374_v15, %v3382_v30  ;;  %v4520_v8 = vld [vmem:[#allocation14 + $0x70] ss:$8 sps:$4 sm:$0xff]   ;;  %v4523_v3 = vld [vmem:[#allocation16 + $0x40] sm:$0xff]   ;;  %v4525_v30 = vld [vmem:[#allocation16 + $0x48] sm:$0xff]  }
 0x953   :  { %v4524_v15 = vld [vmem:[#allocation16] sm:$0xff]   ;;  %4182 = vmatprep.subr.bf16.mxu0 %v4523_v3 }
 0x954   :  { %v3398_v25 = vrot.slane %v3384_v29, %v5249_v54  ;;  %v3414_v28 = vrot.slane %v3400_v11, %v5249_v54  ;;  %v3391_v14 = vrot.slane %v3383_v12, %v5249_v54  ;;  %v3407_v9 = vrot.slane %v3399_v13, %v5249_v54  ;;  %v4526_v29 = vld [vmem:[#allocation16 + $0x8] sm:$0xff]  }
 0x956   :  { %v3417_v51 = vcombine.low %v3398_v25, %v3414_v28  ;;  %v3416_v55 = vcombine.high %v3391_v14, %v3407_v9  ;;  %v3415_v10 = vcombine.low %v3391_v14, %v3407_v9  ;;  %v3418_v46 = vcombine.high %v3398_v25, %v3414_v28 }
 0x958   :  { %v4446_v7 = vpack.i.bf16 %v3417_v51, %v2117_v26  ;;  %v4441_v0 = vpack.i.bf16 %v3416_v55, %v2116_v16  ;;  %v4451_v59 = vpack.i.bf16 %v3418_v46, %v2118_v21 }
 0x95a   :  { %4447 = vrot.lane.b32.xlu1 %v4446_v7, %s5822_s25  ;;  %4442 = vrot.lane.b32.xlu0 %v4441_v0, %s4843_s9 }
 0x95e   :  { %4452 = vrot.lane.b32.xlu0 %v4451_v59, %s4842_s3 }
 0x9cc   :  { %v4448_v54 = vpop.permute.xlu1 %4447  ;;  %v4443_v38 = vpop.permute.xlu0 %4442 }
 0x9cd   :  { %v4445_v40 = vunpack.i.h.bf16 %v4443_v38  ;;  %v4444_v41 = vunpack.i.l.bf16 %v4443_v38  ;;  %v4450_v42 = vunpack.i.h.bf16 %v4448_v54  ;;  %v4449_v26 = vunpack.i.l.bf16 %v4448_v54 }
 0x9cf   :  { %v2131_v16 = vsel %vm1577_vm1, %v2115_v60, %v4444_v41  ;;  %v3431_v27 = vsel %vm1577_vm1, %v3415_v10, %v4445_v40  ;;  %v4058_v40 = vld [vmem:[%s5801_s14] ss:$0 sm:$0xff] }
 0x9d0   :  { %v4453_v52 = vpop.permute.xlu0 %4452  ;;  %v2133_v35 = vsel %vm2132_vm3, %v2131_v16, %v4449_v26  ;;  %v3432_v24 = vsel %vm2132_vm3, %v3431_v27, %v4450_v42  ;;  %v4059_v27 = vld [vmem:[%s5802_s15] ss:$0 sm:$0xff] }
 0x9d1   :  { %v4455_v21 = vunpack.i.h.bf16 %v4453_v52  ;;  %v4454_v18 = vunpack.i.l.bf16 %v4453_v52 }
 0x9d3   :  { %v2135_v33 = vsel %vm2134_vm4, %v2133_v35, %v4454_v18  ;;  %v3433_v48 = vsel %vm2134_vm4, %v3432_v24, %v4455_v21  ;;  %v4527_v24 = vld [vmem:[#allocation16 + $0x50] sm:$0xff]  }
 0x9d4   :  { %v3434_v23 = vpack.c.bf16 %v3433_v48, %v2135_v33  ;;  %v4528_v33 = vld [vmem:[#allocation16 + $0x10] sm:$0xff]   ;;  %v4529_v48 = vld [vmem:[#allocation16 + $0x58] sm:$0xff]  }
 0x9d6   :  { %4417 = vmatmul.mubr.bf16.vlgmr.msra.gmra.mrb[28].mxu0 %v3434_v23  ;;  %v4530_v23 = vld [vmem:[#allocation16 + $0x18] sm:$0xff]  }
 0x9d7   :  { %4183 = vmatpush3.bf16.msra.mxu0 %v4524_v15 }
 0x9d8   :  { %4184 = vmatprep.subr.bf16.mxu0 %v4525_v30 }
 0x9db   :  { %4185 = vmatpush3.bf16.msra.mxu0 %v4526_v29 }
 0x9dc   :  { %4186 = vmatprep.subr.bf16.mxu0 %v4527_v24 }
 0x9df   :  { %4187 = vmatpush3.bf16.msra.mxu0 %v4528_v33 }
 0x9e0   :  { %4188 = vmatprep.subr.bf16.mxu0 %v4529_v48 }
 0x9e3   :  { %4189 = vmatpush3.bf16.msra.mxu0 %v4530_v23 }
 0xaa9   :  { %v3540_v31 = vpop.f32.mrb[28].mxu0 }
 0xaaa   :  { %v3541_v56 = vadd.f32 %v4049_v50, %v3540_v31  ;;  %v4418_v60 = vpop.f32.mrb[29].mxu0  ;;  %v4532_v31 = vld [vmem:[#allocation16 + $0x20] sm:$0xff]  }
 0xaab   :  { %v3543_v57 = vpop.f32.mrb[30].mxu0  ;;  %v4534_v60 = vld [vmem:[#allocation16 + $0x28] sm:$0xff]  }
 0xaac   :  { %v5737_v19 = vadd.f32 %v3541_v56, %v5189_v2  ;;  %v3544_v5 = vadd.f32 %v4049_v50, %v3543_v57  ;;  %v4419_v20 = vpop.f32.mrb[31].mxu0  ;;  %v4501_v2 = vld [vmem:[#allocation14 + $0x4] ss:$8 sps:$4 sm:$0xff]   ;;  %v4535_v57 = vld [vmem:[#allocation16 + $0x70] sm:$0xff]  }
 0xaad   :  { %3702 = vmatprep.subr.bf16.mxu1 %v4501_v2  ;;  %v4531_v50 = vld [vmem:[#allocation16 + $0x60] sm:$0xff]   ;;  %v4533_v56 = vld [vmem:[#allocation16 + $0x68] sm:$0xff]   ;;  %v4538_v20 = vld [vmem:[#allocation16 + $0x38] sm:$0xff]  }
 0xaae   :  { %v5740_v22 = vadd.f32 %v3544_v5, %v5187_v1  ;;  %3551 = vadd.xlane.f32.xlu1 %v5737_v19  ;;  %v3557_v36 = vmul.f32 %v5737_v19, %v5737_v19  ;;  %3703 = vmatpush1.bf16.msra.mxu1 %v4499_v61  ;;  %v4505_v1 = vld [vmem:[#allocation14 + $0x20] ss:$8 sps:$4 sm:$0xff]   ;;  %v4537_v5 = vld [vmem:[#allocation16 + $0x78] sm:$0xff]  }
 0xaaf   :  { %3704 = vmatprep.subr.bf16.mxu1 %v4504_v47  ;;  %4190 = vmatprep.subr.bf16.mxu0 %v4531_v50 }
 0xab0   :  { %3553 = vadd.xlane.f32.xlu0 %v5740_v22  ;;  %v3558_v17 = vmul.f32 %v5740_v22, %v5740_v22  ;;  %4191 = vmatpush3.bf16.msra.mxu0 %v4532_v31 }
 0xab1   :  { %4192 = vmatprep.subr.bf16.mxu0 %v4533_v56 }
 0xab2   :  { %3705 = vmatpush1.bf16.msra.mxu1 %v4502_v44 }
 0xab3   :  { %3706 = vmatprep.subr.bf16.mxu1 %v4507_v39 }
 0xab4   :  { %3559 = vadd.xlane.f32.xlu0 %v3557_v36  ;;  %4193 = vmatpush3.bf16.msra.mxu0 %v4534_v60  ;;  %v3610_v36 = vld [vmem:[%s5804_s17] sm:$0x3] }
 0xab5   :  { %4194 = vmatprep.subr.bf16.mxu0 %v4535_v57 }
 0xab6   :  { %3707 = vmatpush1.bf16.msra.mxu1 %v4505_v1 }
 0xab7   :  { %3708 = vmatprep.subr.bf16.mxu1 %v4510_v63 }
 0xab8   :  { %3561 = vadd.xlane.f32.xlu0 %v3558_v17  ;;  %v3618_v17 = vsub.s32 1, %v5243_v43 }
 0xaba   :  { %3709 = vmatpush1.bf16.msra.mxu1 %v4508_v6  ;;  %v3619_v2 = vrot.slane %v3610_v36, %v3618_v17 }
 0xabb   :  { %3710 = vmatprep.subr.bf16.mxu1 %v4513_v49 }
 0xabe   :  { %3711 = vmatpush1.bf16.msra.mxu1 %v4511_v34 }
 0xabf   :  { %3712 = vmatprep.subr.bf16.mxu1 %v4516_v53 }
 0xac2   :  { %3713 = vmatpush1.bf16.msra.mxu1 %v4514_v58 }
 0xac3   :  { %3714 = vmatprep.subr.bf16.mxu1 %v4519_v37 }
 0xac6   :  { %3715 = vmatpush1.bf16.msra.mxu1 %v4517_v45 }
 0xac7   :  { %3716 = vmatprep.subr.bf16.mxu1 %v4522_v4 }
 0xaca   :  { %3717 = vmatpush1.bf16.msra.mxu1 %v4520_v8 }
 0xb3b   :  { %v3552_v11 = vpop.xlane.xlu1 %3551 }
 0xb3c   :  { %v3555_v13 = vmul.f32 0.0078125, %v3552_v11 }
 0xb3d   :  { %v3554_v12 = vpop.xlane.xlu0 %3553 }
 0xb3e   :  { %v3565_v28 = vmul.f32 %v3555_v13, %v3555_v13  ;;  %v3556_v14 = vmul.f32 0.0078125, %v3554_v12  ;;  %v3569_v59 = vsub.f32 %v5737_v19, %v3555_v13  ;;  %v4536_v19 = vld [vmem:[#allocation16 + $0x30] sm:$0xff]  }
 0xb3f   :  { %4195 = vmatpush3.bf16.msra.mxu0 %v4536_v19 }
 0xb40   :  { %v3566_v55 = vmul.f32 %v3556_v14, %v3556_v14  ;;  %v3570_v41 = vsub.f32 %v5740_v22, %v3556_v14  ;;  %4196 = vmatprep.subr.bf16.mxu0 %v4537_v5  ;;  %v3614_v22 = vsub.s32 0, %v5243_v43 }
 0xb41   :  { %v3560_v25 = vpop.xlane.xlu0 %3559 }
 0xb42   :  { %v3563_v9 = vmul.f32 0.0078125, %v3560_v25  ;;  %v3615_v61 = vrot.slane %v3610_v36, %v3614_v22 }
 0xb43   :  { %4197 = vmatpush3.bf16.msra.mxu0 %v4538_v20 }
 0xb44   :  { %v3567_v32 = vsub.f32 %v3563_v9, %v3565_v28 }
 0xb45   :  { %v3562_v51 = vpop.xlane.xlu0 %3561 }
 0xb46   :  { %v3571_v10 = vadd.f32 1e-05, %v3567_v32  ;;  %v3564_v46 = vmul.f32 0.0078125, %v3562_v51 }
 0xb48   :  { %4583 = vrsqrt.f32 %v3571_v10  ;;  %v3568_v7 = vsub.f32 %v3564_v46, %v3566_v55  ;;  %v4076_v46 = vld [vmem:[%s5806_s19] ss:$0 sm:$0xff] }
 0xb4a   :  { %v3572_v0 = vadd.f32 1e-05, %v3568_v7 }
 0xb4c   :  { %4585 = vrsqrt.f32 %v3572_v0 }
 0xb52   :  { %v4584_v54 = vpop.eup %4583 }
 0xb53   :  { %v3575_v38 = vmul.f32 %v4584_v54, %v3569_v59 }
 0xb55   :  { %v3583_v16 = vmul.f32 %v4058_v40, %v3575_v38 }
 0xb56   :  { %v4586_v42 = vpop.eup %4585 }
 0xb57   :  { %v3576_v26 = vmul.f32 %v4586_v42, %v3570_v41  ;;  %v5756_v21 = vadd.f32 %v4059_v27, %v3583_v16 }
 0xb59   :  { %v3584_v52 = vmul.f32 %v4058_v40, %v3576_v26 }
 0xb5b   :  { %v5758_v18 = vadd.f32 %v4059_v27, %v3584_v52 }
 0xb5d   :  { %v3593_v35 = vpack.c.bf16 %v5758_v18, %v5756_v21 }
 0xb5f   :  { %3735 = vmatmul.mubr.bf16.vlgmr.msra.gmra.mrb[56].mxu1 %v3593_v35 }
 0xc32   :  { %v3736_v44 = vpop.f32.mrb[56].mxu1 }
 0xc33   :  { %v3737_v47 = vadd.f32 %v3736_v44, %v3615_v61  ;;  %v3738_v1 = vpop.f32.mrb[57].mxu1 }
 0xc34   :  { %v3739_v39 = vadd.f32 %v3738_v1, %v3619_v2  ;;  %v3740_v63 = vpop.f32.mrb[58].mxu1 }
 0xc35   :  { %v3749_v6 = vmul.f32 0.70710677, %v3737_v47  ;;  %v3741_v49 = vadd.f32 %v3740_v63, %v3615_v61  ;;  %v3742_v62 = vpop.f32.mrb[59].mxu1  ;;  %v3745_v30 = vmul.f32 0.5, %v3737_v47 }
 0xc36   :  { %v3750_v34 = vmul.f32 0.70710677, %v3739_v39  ;;  %v3743_v53 = vadd.f32 %v3742_v62, %v3619_v2  ;;  %v3746_v12 = vmul.f32 0.5, %v3739_v39 }
 0xc37   :  { %4587 = verf.f32 %v3749_v6  ;;  %v3751_v58 = vmul.f32 0.70710677, %v3741_v49  ;;  %v3747_v29 = vmul.f32 0.5, %v3741_v49 }
 0xc38   :  { %4589 = verf.f32 %v3750_v34  ;;  %v3752_v37 = vmul.f32 0.70710677, %v3743_v53  ;;  %v3748_v13 = vmul.f32 0.5, %v3743_v53 }
 0xc39   :  { %4591 = verf.f32 %v3751_v58 }
 0xc3a   :  { %4593 = verf.f32 %v3752_v37 }
 0xc41   :  { %v4588_v45 = vpop.eup %4587 }
 0xc42   :  { %v4590_v43 = vpop.eup %4589  ;;  %v3757_v4 = vadd.f32 1.0, %v4588_v45 }
 0xc43   :  { %v4592_v8 = vpop.eup %4591  ;;  %v3758_v3 = vadd.f32 1.0, %v4590_v43 }
 0xc44   :  { %v4594_v15 = vpop.eup %4593  ;;  %v3759_v11 = vadd.f32 1.0, %v4592_v8  ;;  %v3761_v28 = vmul.f32 %v3757_v4, %v3745_v30 }
 0xc45   :  { %v3760_v25 = vadd.f32 1.0, %v4594_v15  ;;  %v3762_v9 = vmul.f32 %v3758_v3, %v3746_v12 }
 0xc46   :  { %v3763_v14 = vmul.f32 %v3759_v11, %v3747_v29 }
 0xc47   :  { %v3764_v32 = vmul.f32 %v3760_v25, %v3748_v13 }
 0xc48   :  { %v3765_v51 = vpack.c.bf16 %v3763_v14, %v3761_v28 }
 0xc49   :  { %v3766_v55 = vpack.c.bf16 %v3764_v32, %v3762_v9 }
 0xc4b   :  { %3934 = vmatprep.mubr.bf16.mxu0 %v3766_v55 }
 0xc4c   :  { %3935 = vmatmul.mubr.bf16.vlgmr.msra.gmra.mrb[32].mxu0 %v3765_v51 }
 0xd1f   :  { %v4198_v10 = vpop.f32.mrb[32].mxu0 }
 0xd20   :  { %v4199_v7 = vpop.f32.mrb[33].mxu0 }
 0xd21   :  { %v4200_v0 = vadd.f32 %v4199_v7, %v4198_v10  ;;  %v4201_v59 = vpop.f32.mrb[34].mxu0 }
 0xd22   :  { %v4202_v54 = vpop.f32.mrb[35].mxu0 }
 0xd23   :  { %v3937_v38 = vadd.f32 %v4200_v0, %v4076_v46  ;;  %v4203_v40 = vadd.f32 %v4202_v54, %v4201_v59 }
 0xd25   :  { %v3943_v41 = vadd.f32 %v3937_v38, %v5756_v21  ;;  %v3940_v42 = vadd.f32 %v4203_v40, %v4076_v46 }
 0xd27   :  { %3945 = vst [vmem:[#allocation17] sm:$0xff] %v3943_v41  ;;  %v3944_v26 = vadd.f32 %v3940_v42, %v5758_v18 }
 0xd29   :  { %3946 = vst [vmem:[#allocation17 + $0x8] sm:$0xff] %v3944_v26 }
 0xd2a   :  { %4804 = shalt.err (!%p4801_p6)
}
 0xd2b   :  { %s5826_s20 = sld [smem:[#allocation29_spill]] }
 0xd31   :  { %s4805_s26 = scalar_lea.hbm %s5826_s20, 256 }
 0xd32   :  { %p4806_p7 = scmp.ne.s32.totalorder %s5826_s20, %s4805_s26  ;;  %p4809_p8 = scmp.lt.u32.totalorder %s4805_s26, %s5826_s20 }
 0xd34   :  { %p4811_p9 = pnand %p4809_p8, %p4806_p7 }
 0xd36   :  { %4814 = shalt.err (!%p4811_p9)
}
 0xd37   :  { %3958 = dma.vmem_to_hbm [thread:$0]  %s3953_s6, 256, %s5826_s20, [#allocation4], %s4833_s10, %s4833_s10, %s4834_s23  }
 0xd38   :  { %4825 = dma.done.wait [#allocation4], 256  }
 0xd39   :  { %4826 = vsyncadd [#allocation4], 4294967040 }
 0xd3a   :  { %3962 = vsyncpa [#allocation3], 1 }
 0xd3b   :  { %3963 = vsyncpa [#allocation6], 1 }
 0xd3c   :  { %3964 = vsyncpa [#allocation9], 1 }
 0xd3d   :  { %3965 = vsyncpa [#allocation12], 1 }
 0xd3e   :  { %3966 = vsyncpa [#allocation15], 1 }
 0xd3f   :  { %3967 = vsyncpa [#allocation4], 1 }

</bundles_post_ra>
